<compile_context>
chip_gen: v5e
topology: v5e:2x2
jax: 0.10.0
libtpu: 0.0.40
codegen_flags: <defaults>
</compile_context>

<pallas_src>
import jax
import jax.numpy as jnp
from jax.experimental import pallas as pl
from jax.experimental.pallas import tpu as pltpu


# ------------------- fused qkv 1x1 conv + depthwise 3x3 conv -----------------

def _make_qkv_dw_kernel(W):
    """Kernel for one (batch, channel-tile) step.

    Refs (after None-dim squeeze):
      xp_ref  : (C, Hp*Wp)     zero-padded input image, spatially flattened
      wq_ref  : (ct, C)        slice of the 1x1 qkv conv weight
      wd_ref  : (ct, 9)        depthwise 3x3 weights (flattened taps) for slice
      mask_ref: (1, H*Wp)      1.0 on real columns, 0.0 on the 2 pad cols / row
      o_ref   : (ct, H*Wp)     dwconv(qkv(x)) with pad columns zeroed
      scratch : (ct, Hp*Wp+Wp) f32 VMEM
    """
    Wp = W + 2

    def kernel(xp_ref, wq_ref, wd_ref, mask_ref, o_ref, scratch_ref):
        ct, n_out = o_ref.shape            # (channel tile, H*Wp)
        n_in = xp_ref.shape[1]             # Hp*Wp
        # 1x1 conv: one MXU matmul over channels for the whole padded image.
        scratch_ref[:, 0:n_in] = jnp.dot(
            wq_ref[...], xp_ref[...], preferred_element_type=jnp.float32)
        # Zero the scratch tail so overhanging taps of the last row read 0
        # (also guarantees no uninitialized VMEM is ever read).
        scratch_ref[:, n_in:n_in + Wp] = jnp.zeros((ct, Wp), jnp.float32)

        # Depthwise 3x3 (padding=1): 9 shifted slices along the flattened
        # spatial axis, accumulated in f32.
        acc = jnp.zeros((ct, n_out), jnp.float32)
        for di in range(3):
            for dj in range(3):
                off = di * Wp + dj
                wtap = wd_ref[:, di * 3 + dj:di * 3 + dj + 1].astype(jnp.float32)
                acc = acc + wtap * scratch_ref[:, off:off + n_out]
        # Zero the per-row pad columns so they are inert downstream.
        acc = jnp.where(mask_ref[...] > 0.5, acc, 0.0)
        o_ref[...] = acc.astype(o_ref.dtype)

    return kernel


def fused_qkv_dwconv(x_pad_flat, w_qkv, w_dw9, mask, H, W, ctile):
    """x_pad_flat: (B, C, Hp*Wp) -> (B, 3C, H*Wp), pad columns zeroed."""
    B, C, n_in = x_pad_flat.shape
    C3 = w_qkv.shape[0]
    Wp = W + 2
    n_out = H * Wp
    n_ct = C3 // ctile
    flops = int(B * (2 * C * C3 * n_in + 18 * C3 * n_out))
    bytes_accessed = int(4 * (B * (n_ct * C * n_in + C3 * n_out) + C3 * (C + 9)))
    return pl.pallas_call(
        _make_qkv_dw_kernel(W),
        out_shape=jax.ShapeDtypeStruct((B, C3, n_out), x_pad_flat.dtype),
        grid=(B, n_ct),
        in_specs=[
            pl.BlockSpec((None, C, n_in), lambda b, c: (b, 0, 0)),
            pl.BlockSpec((ctile, C), lambda b, c: (c, 0)),
            pl.BlockSpec((ctile, 9), lambda b, c: (c, 0)),
            pl.BlockSpec((1, n_out), lambda b, c: (0, 0)),
        ],
        out_specs=pl.BlockSpec((None, ctile, n_out), lambda b, c: (b, c, 0)),
        scratch_shapes=[pltpu.VMEM((ctile, n_in + Wp), jnp.float32)],
        compiler_params=pltpu.CompilerParams(
            dimension_semantics=("parallel", "parallel")),
        cost_estimate=pl.CostEstimate(
            flops=flops, transcendentals=0, bytes_accessed=bytes_accessed),
    )(x_pad_flat, w_qkv, w_dw9, mask)


# ----------------------------- channel attention -----------------------------

def _chan_attn_kernel(temp_ref, q_ref, k_ref, v_ref, o_ref):
    # q/k/v refs: (c_head, HWp) for the current (batch, head); temp_ref: SMEM.
    head = pl.program_id(1)
    q = q_ref[...].astype(jnp.float32)
    k = k_ref[...].astype(jnp.float32)
    # F.normalize(dim=-1), eps=1e-12, via rsqrt on the EUP.
    qn = q * jax.lax.rsqrt(jnp.maximum(jnp.sum(q * q, axis=-1, keepdims=True), 1e-24))
    kn = k * jax.lax.rsqrt(jnp.maximum(jnp.sum(k * k, axis=-1, keepdims=True), 1e-24))
    # attn[i, j] = sum_t qn[i, t] * kn[j, t]  -> (c_head, c_head)
    attn = jax.lax.dot_general(qn, kn, (((1,), (1,)), ((), ())),
                               preferred_element_type=jnp.float32)
    attn = attn * temp_ref[head]
    attn = attn - jnp.max(attn, axis=-1, keepdims=True)
    p = jnp.exp(attn)
    p = p * pl.reciprocal(jnp.sum(p, axis=-1, keepdims=True), approx=True)
    # out (c_head, HWp): bf16 MXU operands, f32 accumulation.
    out = jnp.dot(p.astype(jnp.bfloat16), v_ref[...].astype(jnp.bfloat16),
                  preferred_element_type=jnp.float32)
    o_ref[...] = out.astype(o_ref.dtype)


def channel_attention(qkv, temp, num_heads):
    """qkv: (B, 3C, HWp) channels-first; returns (B, C, HWp)."""
    B, C3, HWp = qkv.shape
    C = C3 // 3
    CH = C // num_heads
    q_spec = pl.BlockSpec((None, CH, HWp), lambda b, h: (b, h, 0))
    k_spec = pl.BlockSpec((None, CH, HWp), lambda b, h: (b, num_heads + h, 0))
    v_spec = pl.BlockSpec((None, CH, HWp), lambda b, h: (b, 2 * num_heads + h, 0))
    return pl.pallas_call(
        _chan_attn_kernel,
        out_shape=jax.ShapeDtypeStruct((B, C, HWp), qkv.dtype),
        grid=(B, num_heads),
        in_specs=[pl.BlockSpec(memory_space=pltpu.MemorySpace.SMEM),
                  q_spec, k_spec, v_spec],
        out_specs=pl.BlockSpec((None, CH, HWp), lambda b, h: (b, h, 0)),
        compiler_params=pltpu.CompilerParams(
            dimension_semantics=("parallel", "parallel")),
        cost_estimate=pl.CostEstimate(
            flops=int(4 * B * num_heads * CH * CH * HWp),
            transcendentals=int(B * num_heads * CH * CH),
            bytes_accessed=int(16 * B * C * HWp)),
    )(temp, qkv, qkv, qkv)


# ------------------------------- project_out ---------------------------------

def _project_kernel(w_ref, x_ref, o_ref):
    o_ref[...] = jnp.dot(w_ref[...], x_ref[...],
                         preferred_element_type=jnp.float32).astype(o_ref.dtype)


def project_out(x, w_out):
    """1x1 conv over channels. x: (B, C, N), w_out: (C, C) -> (B, C, N)."""
    B, C, N = x.shape
    tn = N if N <= 2048 else 2048       # lane-dense spatial tile (multiple of 128)
    return pl.pallas_call(
        _project_kernel,
        out_shape=jax.ShapeDtypeStruct((B, C, N), x.dtype),
        grid=(B, pl.cdiv(N, tn)),
        in_specs=[pl.BlockSpec((C, C), lambda b, j: (0, 0)),
                  pl.BlockSpec((None, C, tn), lambda b, j: (b, 0, j))],
        out_specs=pl.BlockSpec((None, C, tn), lambda b, j: (b, 0, j)),
        compiler_params=pltpu.CompilerParams(
            dimension_semantics=("parallel", "parallel")),
        cost_estimate=pl.CostEstimate(
            flops=int(2 * B * C * C * N), transcendentals=0,
            bytes_accessed=int(8 * B * C * N + 4 * C * C)),
    )(w_out, x)


# ------------------------------ module forward -------------------------------

def channel_mhsa_forward(x, w_qkv, w_dw, w_out, temp, num_heads):
    """x: (B, C, H, W) NCHW; returns (B, C, H, W).  Matches the PyTorch module."""
    B, C, H, W = x.shape
    C3 = 3 * C
    CH = C // num_heads
    assert C % num_heads == 0 and CH % 8 == 0, \
        "c_head must be a multiple of 8 (TPU second-minor block constraint)"
    Hp, Wp = H + 2, W + 2

    # Channel tile for the fused kernel (bounds VMEM, adds parallel grid steps).
    ctile = 128 if C3 % 128 == 0 else C3
    # TODO(synk): generic divisor search + spatial strip tiling of the fused and
    # attention kernels for very large H*W (v7x 64 MiB VMEM).

    # Zero-pad spatially once on x: the bias-free 1x1 conv commutes with zero
    # padding, so the (3x larger) qkv tensor never needs a separate pad pass.
    x_pad = jnp.pad(x, ((0, 0), (0, 0), (1, 1), (1, 1))).reshape(B, C, Hp * Wp)

    # 1.0 on real columns, 0.0 on the 2 pad columns each image row carries.
    mask = (jnp.arange(H * Wp, dtype=jnp.int32) % Wp < W)
    mask = mask.astype(x.dtype).reshape(1, H * Wp)

    w_dw9 = w_dw.reshape(C3, 9)                                    # (3C, 3, 3) -> (3C, 9)

    qkv = fused_qkv_dwconv(x_pad, w_qkv, w_dw9, mask, H, W, ctile)  # (B, 3C, H*Wp)
    out = channel_attention(qkv, temp, num_heads)                   # (B, C,  H*Wp)
    out = project_out(out, w_out)                                   # (B, C,  H*Wp)
    # Drop the per-row pad columns: (B, C, H*Wp) -> (B, C, H, W).
    return out.reshape(B, C, H, Wp)[:, :, :, :W]


# ----------------------------- pure-JAX reference ----------------------------

def ref_forward(x, w_qkv, w_dw, w_out, temp, num_heads):
    B, C, H, W = x.shape
    hi = jax.lax.Precision.HIGHEST
    qkv = jnp.einsum('oc,bchw->bohw', w_qkv, x, precision=hi)
    w_dw4 = w_dw[:, None, :, :]  # (3C, 1, 3, 3) depthwise weights
    qkv = jax.lax.conv_general_dilated(
        qkv, w_dw4, window_strides=(1, 1), padding=((1, 1), (1, 1)),
        dimension_numbers=('NCHW', 'OIHW', 'NCHW'),
        feature_group_count=3 * C, precision=hi)
    q, k, v = jnp.split(qkv, 3, axis=1)
    ch = C // num_heads

    def to_heads(t):
        return t.reshape(B, num_heads, ch, H * W)

    q, k, v = map(to_heads, (q, k, v))
    qn = q / jnp.maximum(jnp.linalg.norm(q, axis=-1, keepdims=True), 1e-12)
    kn = k / jnp.maximum(jnp.linalg.norm(k, axis=-1, keepdims=True), 1e-12)
    attn = jnp.einsum('bhcd,bhed->bhce', qn, kn, precision=hi)
    attn = attn * temp[None, :, None, None]
    attn = jax.nn.softmax(attn, axis=-1)
    out = jnp.einsum('bhce,bhed->bhcd', attn, v, precision=hi)
    out = out.reshape(B, C, H, W)
    out = jnp.einsum('oc,bchw->bohw', w_out, out, precision=hi)
    return out


# --------------------------------- demo / check ------------------------------

if __name__ == "__main__":
    key = jax.random.PRNGKey(0)
    B, C, H, W = 2, 16, 16, 16
    num_heads = 2

    k_x, k_qkv, k_dw, k_out = jax.random.split(key, 4)
    x = jax.random.normal(k_x, (B, C, H, W), jnp.float32)
    # deterministic synthetic parameters (shapes from the module __init__)
    w_qkv = 0.2 * jax.random.normal(k_qkv, (3 * C, C), jnp.float32)      # Conv2d(C, 3C, 1)
    w_dw = 0.2 * jax.random.normal(k_dw, (3 * C, 3, 3), jnp.float32)     # depthwise Conv2d(3C, 3C, 3)
    w_out = 0.2 * jax.random.normal(k_out, (C, C), jnp.float32)          # Conv2d(C, C, 1)
    # temperature: torch.ones(num_heads,1,1); perturbed so the path is exercised
    temp = jnp.ones((num_heads,), jnp.float32) + 0.1 * jnp.arange(num_heads, dtype=jnp.float32)

    fwd = jax.jit(channel_mhsa_forward, static_argnums=(5,))
    out = jax.block_until_ready(fwd(x, w_qkv, w_dw, w_out, temp, num_heads))

    ref = ref_forward(x, w_qkv, w_dw, w_out, temp, num_heads)
    err = float(jnp.max(jnp.abs(out - ref)))
    assert out.shape == (B, C, H, W)
    assert err < 5e-2, f"max abs err too large: {err}"
    print("KERNEL_OK")
</pallas_src>

<mosaic_0001>
module attributes {stable_mosaic.version = 11 : i64} {
  func.func @_project_kernel(%arg0: i32, %arg1: i32, %arg2: memref<16x16xf32, #tpu.memory_space<vmem>>, %arg3: memref<1x16x288xf32, #tpu.memory_space<vmem>>, %arg4: memref<1x16x288xf32, #tpu.memory_space<vmem>>) attributes {dimension_semantics = [#tpu.dimension_semantics<parallel>, #tpu.dimension_semantics<parallel>], iteration_bounds = array<i64: 2, 1>, scalar_prefetch = 0 : i64, scratch_operands = 0 : i64, tpu.core_type = #tpu.core_type<tc>, window_params = [{pipeline_mode = #tpu.pipeline_mode<synchronous>, transform_indices = @transform_0, window_bounds = array<i64: 16, 16>}, {transform_indices = @transform_1, window_bounds = array<i64: 1, 16, 288>}, {transform_indices = @transform_2, window_bounds = array<i64: 1, 16, 288>}]} {
    %c0 = arith.constant 0 : index
    %c0_0 = arith.constant 0 : index
    %0 = vector.load %arg2[%c0, %c0_0] : memref<16x16xf32, #tpu.memory_space<vmem>>, vector<16x16xf32>
    %c0_1 = arith.constant 0 : index
    %c0_2 = arith.constant 0 : index
    %c0_3 = arith.constant 0 : index
    %1 = vector.load %arg3[%c0_1, %c0_2, %c0_3] : memref<1x16x288xf32, #tpu.memory_space<vmem>>, vector<1x16x288xf32>
    %2 = vector.shape_cast %1 : vector<1x16x288xf32> to vector<16x288xf32>
    %cst = arith.constant dense<0.000000e+00> : vector<16x288xf32>
    %3 = tpu.matmul %0, %2, %cst {dimension_numbers = #tpu.dot_dimension_numbers<[1], [0], [0], [1], [0, 0, 1, 1], [], []>} : vector<16x16xf32>, vector<16x288xf32>, vector<16x288xf32> -> vector<16x288xf32>
    %c0_4 = arith.constant 0 : index
    %c0_5 = arith.constant 0 : index
    %c0_6 = arith.constant 0 : index
    %4 = vector.load %arg4[%c0_4, %c0_5, %c0_6] : memref<1x16x288xf32, #tpu.memory_space<vmem>>, vector<1x16x288xf32>
    %5 = vector.shape_cast %4 : vector<1x16x288xf32> to vector<16x288xf32>
    %6 = vector.shape_cast %3 : vector<16x288xf32> to vector<1x16x288xf32>
    tpu.vector_store %arg4[%c0_4, %c0_5, %c0_6], %6 {strides = array<i32>} : memref<1x16x288xf32, #tpu.memory_space<vmem>>, vector<1x16x288xf32>,
    return
  }
  func.func @transform_0(%arg0: i32, %arg1: i32) -> (i32, i32) {
    %c0_i32 = arith.constant 0 : i32
    %c0_i32_0 = arith.constant 0 : i32
    %c0_i32_1 = arith.constant 0 : i32
    return %c0_i32, %c0_i32_0 : i32, i32
  }
  func.func @transform_1(%arg0: i32, %arg1: i32) -> (i32, i32, i32) {
    %c0_i32 = arith.constant 0 : i32
    %c0_i32_0 = arith.constant 0 : i32
    return %arg0, %c0_i32, %arg1 : i32, i32, i32
  }
  func.func @transform_2(%arg0: i32, %arg1: i32) -> (i32, i32, i32) {
    %c0_i32 = arith.constant 0 : i32
    %c0_i32_0 = arith.constant 0 : i32
    return %arg0, %c0_i32, %arg1 : i32, i32, i32
  }
}

module attributes {stable_mosaic.version = 11 : i64} {
  func.func @_chan_attn_kernel(%arg0: i32, %arg1: i32, %arg2: memref<2xf32, #tpu.memory_space<smem>>, %arg3: memref<1x8x288xf32, #tpu.memory_space<vmem>>, %arg4: memref<1x8x288xf32, #tpu.memory_space<vmem>>, %arg5: memref<1x8x288xf32, #tpu.memory_space<vmem>>, %arg6: memref<1x8x288xf32, #tpu.memory_space<vmem>>) attributes {dimension_semantics = [#tpu.dimension_semantics<parallel>, #tpu.dimension_semantics<parallel>], iteration_bounds = array<i64: 2, 2>, scalar_prefetch = 0 : i64, scratch_operands = 0 : i64, tpu.core_type = #tpu.core_type<tc>, window_params = [{transform_indices = @transform_0, window_bounds = array<i64: 2>}, {transform_indices = @transform_1, window_bounds = array<i64: 1, 8, 288>}, {transform_indices = @transform_2, window_bounds = array<i64: 1, 8, 288>}, {transform_indices = @transform_3, window_bounds = array<i64: 1, 8, 288>}, {transform_indices = @transform_4, window_bounds = array<i64: 1, 8, 288>}]} {
    %c0 = arith.constant 0 : index
    %c0_0 = arith.constant 0 : index
    %c0_1 = arith.constant 0 : index
    %0 = vector.load %arg3[%c0, %c0_0, %c0_1] : memref<1x8x288xf32, #tpu.memory_space<vmem>>, vector<1x8x288xf32>
    %1 = vector.shape_cast %0 : vector<1x8x288xf32> to vector<8x288xf32>
    %c0_2 = arith.constant 0 : index
    %c0_3 = arith.constant 0 : index
    %c0_4 = arith.constant 0 : index
    %2 = vector.load %arg4[%c0_2, %c0_3, %c0_4] : memref<1x8x288xf32, #tpu.memory_space<vmem>>, vector<1x8x288xf32>
    %3 = vector.shape_cast %2 : vector<1x8x288xf32> to vector<8x288xf32>
    %4 = arith.mulf %1, %1 : vector<8x288xf32>
    %cst = arith.constant dense<0.000000e+00> : vector<8xf32>
    %5 = vector.multi_reduction <add>, %4, %cst [1] : vector<8x288xf32> to vector<8xf32>
    %6 = vector.shape_cast %5 : vector<8xf32> to vector<8x1xf32>
    %cst_5 = arith.constant 1.000000e-24 : f32
    %7 = vector.broadcast %cst_5 : f32 to vector<8x1xf32>
    %8 = arith.maximumf %6, %7 : vector<8x1xf32>
    %9 = math.rsqrt %8 : vector<8x1xf32>
    %10 = vector.broadcast %9 : vector<8x1xf32> to vector<8x288xf32>
    %11 = arith.mulf %1, %10 : vector<8x288xf32>
    %12 = arith.mulf %3, %3 : vector<8x288xf32>
    %cst_6 = arith.constant dense<0.000000e+00> : vector<8xf32>
    %13 = vector.multi_reduction <add>, %12, %cst_6 [1] : vector<8x288xf32> to vector<8xf32>
    %14 = vector.shape_cast %13 : vector<8xf32> to vector<8x1xf32>
    %cst_7 = arith.constant 1.000000e-24 : f32
    %15 = vector.broadcast %cst_7 : f32 to vector<8x1xf32>
    %16 = arith.maximumf %14, %15 : vector<8x1xf32>
    %17 = math.rsqrt %16 : vector<8x1xf32>
    %18 = vector.broadcast %17 : vector<8x1xf32> to vector<8x288xf32>
    %19 = arith.mulf %3, %18 : vector<8x288xf32>
    %cst_8 = arith.constant dense<0.000000e+00> : vector<8x8xf32>
    %20 = tpu.matmul %11, %19, %cst_8 {dimension_numbers = #tpu.dot_dimension_numbers<[1], [1], [0], [0], [0, 0, 1, 0], [], []>} : vector<8x288xf32>, vector<8x288xf32>, vector<8x8xf32> -> vector<8x8xf32>
    %21 = arith.index_cast %arg1 : i32 to index
    %22 = memref.load %arg2[%21] : memref<2xf32, #tpu.memory_space<smem>>
    %23 = vector.broadcast %22 : f32 to vector<8x8xf32>
    %24 = arith.mulf %20, %23 : vector<8x8xf32>
    %cst_9 = arith.constant dense<0xFF800000> : vector<8xf32>
    %25 = vector.multi_reduction <maximumf>, %24, %cst_9 [1] : vector<8x8xf32> to vector<8xf32>
    %26 = vector.shape_cast %25 : vector<8xf32> to vector<8x1xf32>
    %27 = vector.broadcast %26 : vector<8x1xf32> to vector<8x8xf32>
    %28 = arith.subf %24, %27 : vector<8x8xf32>
    %29 = math.exp %28 : vector<8x8xf32>
    %cst_10 = arith.constant dense<0.000000e+00> : vector<8xf32>
    %30 = vector.multi_reduction <add>, %29, %cst_10 [1] : vector<8x8xf32> to vector<8xf32>
    %31 = vector.shape_cast %30 : vector<8xf32> to vector<8x1xf32>
    %32 = tpu.reciprocal %31 {approx = true} : vector<8x1xf32> -> vector<8x1xf32>
    %33 = vector.broadcast %32 : vector<8x1xf32> to vector<8x8xf32>
    %34 = arith.mulf %29, %33 : vector<8x8xf32>
    %35 = arith.truncf %34 : vector<8x8xf32> to vector<8x8xbf16>
    %c0_11 = arith.constant 0 : index
    %c0_12 = arith.constant 0 : index
    %c0_13 = arith.constant 0 : index
    %36 = vector.load %arg5[%c0_11, %c0_12, %c0_13] : memref<1x8x288xf32, #tpu.memory_space<vmem>>, vector<1x8x288xf32>
    %37 = vector.shape_cast %36 : vector<1x8x288xf32> to vector<8x288xf32>
    %38 = arith.truncf %37 : vector<8x288xf32> to vector<8x288xbf16>
    %cst_14 = arith.constant dense<0.000000e+00> : vector<8x288xf32>
    %39 = tpu.matmul %35, %38, %cst_14 {dimension_numbers = #tpu.dot_dimension_numbers<[1], [0], [0], [1], [0, 0, 1, 1], [], []>} : vector<8x8xbf16>, vector<8x288xbf16>, vector<8x288xf32> -> vector<8x288xf32>
    %c0_15 = arith.constant 0 : index
    %c0_16 = arith.constant 0 : index
    %c0_17 = arith.constant 0 : index
    %40 = vector.load %arg6[%c0_15, %c0_16, %c0_17] : memref<1x8x288xf32, #tpu.memory_space<vmem>>, vector<1x8x288xf32>
    %41 = vector.shape_cast %40 : vector<1x8x288xf32> to vector<8x288xf32>
    %42 = vector.shape_cast %39 : vector<8x288xf32> to vector<1x8x288xf32>
    tpu.vector_store %arg6[%c0_15, %c0_16, %c0_17], %42 {strides = array<i32>} : memref<1x8x288xf32, #tpu.memory_space<vmem>>, vector<1x8x288xf32>,
    return
  }
  func.func @transform_0(%arg0: i32, %arg1: i32) -> i32 {
    %c0_i32 = arith.constant 0 : i32
    %c0_i32_0 = arith.constant 0 : i32
    return %c0_i32 : i32
  }
  func.func @transform_1(%arg0: i32, %arg1: i32) -> (i32, i32, i32) {
    %c0_i32 = arith.constant 0 : i32
    %c0_i32_0 = arith.constant 0 : i32
    return %arg0, %arg1, %c0_i32 : i32, i32, i32
  }
  func.func @transform_2(%arg0: i32, %arg1: i32) -> (i32, i32, i32) {
    %c2_i32 = arith.constant 2 : i32
    %0 = arith.addi %c2_i32, %arg1 : i32
    %c0_i32 = arith.constant 0 : i32
    %c0_i32_0 = arith.constant 0 : i32
    return %arg0, %0, %c0_i32 : i32, i32, i32
  }
  func.func @transform_3(%arg0: i32, %arg1: i32) -> (i32, i32, i32) {
    %c4_i32 = arith.constant 4 : i32
    %0 = arith.addi %c4_i32, %arg1 : i32
    %c0_i32 = arith.constant 0 : i32
    %c0_i32_0 = arith.constant 0 : i32
    return %arg0, %0, %c0_i32 : i32, i32, i32
  }
  func.func @transform_4(%arg0: i32, %arg1: i32) -> (i32, i32, i32) {
    %c0_i32 = arith.constant 0 : i32
    %c0_i32_0 = arith.constant 0 : i32
    return %arg0, %arg1, %c0_i32 : i32, i32, i32
  }
}

module attributes {stable_mosaic.version = 11 : i64} {
  func.func @kernel(%arg0: i32, %arg1: i32, %arg2: memref<1x16x324xf32, #tpu.memory_space<vmem>>, %arg3: memref<48x16xf32, #tpu.memory_space<vmem>>, %arg4: memref<48x9xf32, #tpu.memory_space<vmem>>, %arg5: memref<1x288xf32, #tpu.memory_space<vmem>>, %arg6: memref<1x48x288xf32, #tpu.memory_space<vmem>>, %arg7: memref<48x342xf32, #tpu.memory_space<vmem>>) attributes {dimension_semantics = [#tpu.dimension_semantics<parallel>, #tpu.dimension_semantics<parallel>], iteration_bounds = array<i64: 2, 1>, scalar_prefetch = 0 : i64, scratch_operands = 1 : i64, tpu.core_type = #tpu.core_type<tc>, window_params = [{transform_indices = @transform_0, window_bounds = array<i64: 1, 16, 324>}, {transform_indices = @transform_1, window_bounds = array<i64: 48, 16>}, {transform_indices = @transform_2, window_bounds = array<i64: 48, 9>}, {pipeline_mode = #tpu.pipeline_mode<synchronous>, transform_indices = @transform_3, window_bounds = array<i64: 1, 288>}, {transform_indices = @transform_4, window_bounds = array<i64: 1, 48, 288>}]} {
    %c0 = arith.constant 0 : index
    %c0_0 = arith.constant 0 : index
    %0 = vector.load %arg3[%c0, %c0_0] : memref<48x16xf32, #tpu.memory_space<vmem>>, vector<48x16xf32>
    %c0_1 = arith.constant 0 : index
    %c0_2 = arith.constant 0 : index
    %c0_3 = arith.constant 0 : index
    %1 = vector.load %arg2[%c0_1, %c0_2, %c0_3] : memref<1x16x324xf32, #tpu.memory_space<vmem>>, vector<1x16x324xf32>
    %2 = vector.shape_cast %1 : vector<1x16x324xf32> to vector<16x324xf32>
    %cst = arith.constant dense<0.000000e+00> : vector<48x324xf32>
    %3 = tpu.matmul %0, %2, %cst {dimension_numbers = #tpu.dot_dimension_numbers<[1], [0], [0], [1], [0, 0, 1, 1], [], []>} : vector<48x16xf32>, vector<16x324xf32>, vector<48x324xf32> -> vector<48x324xf32>
    %c0_4 = arith.constant 0 : index
    %c0_5 = arith.constant 0 : index
    %4 = vector.load %arg7[%c0_4, %c0_5] : memref<48x342xf32, #tpu.memory_space<vmem>>, vector<48x324xf32>
    tpu.vector_store %arg7[%c0_4, %c0_5], %3 {strides = array<i32>} : memref<48x342xf32, #tpu.memory_space<vmem>>, vector<48x324xf32>,
    %cst_6 = arith.constant 0.000000e+00 : f32
    %5 = vector.broadcast %cst_6 : f32 to vector<48x18xf32>
    %c0_7 = arith.constant 0 : index
    %c324 = arith.constant 324 : index
    %6 = vector.load %arg7[%c0_7, %c324] : memref<48x342xf32, #tpu.memory_space<vmem>>, vector<48x18xf32>
    tpu.vector_store %arg7[%c0_7, %c324], %5 {strides = array<i32>} : memref<48x342xf32, #tpu.memory_space<vmem>>, vector<48x18xf32>,
    %cst_8 = arith.constant 0.000000e+00 : f32
    %7 = vector.broadcast %cst_8 : f32 to vector<48x288xf32>
    %c0_9 = arith.constant 0 : index
    %c0_10 = arith.constant 0 : index
    %8 = vector.load %arg4[%c0_9, %c0_10] : memref<48x9xf32, #tpu.memory_space<vmem>>, vector<48x1xf32>
    %c0_11 = arith.constant 0 : index
    %c0_12 = arith.constant 0 : index
    %9 = vector.load %arg7[%c0_11, %c0_12] : memref<48x342xf32, #tpu.memory_space<vmem>>, vector<48x288xf32>
    %10 = vector.broadcast %8 : vector<48x1xf32> to vector<48x288xf32>
    %11 = arith.mulf %10, %9 : vector<48x288xf32>
    %12 = arith.addf %7, %11 : vector<48x288xf32>
    %c0_13 = arith.constant 0 : index
    %c1 = arith.constant 1 : index
    %13 = vector.load %arg4[%c0_13, %c1] : memref<48x9xf32, #tpu.memory_space<vmem>>, vector<48x1xf32>
    %c0_14 = arith.constant 0 : index
    %c1_15 = arith.constant 1 : index
    %14 = vector.load %arg7[%c0_14, %c1_15] : memref<48x342xf32, #tpu.memory_space<vmem>>, vector<48x288xf32>
    %15 = vector.broadcast %13 : vector<48x1xf32> to vector<48x288xf32>
    %16 = arith.mulf %15, %14 : vector<48x288xf32>
    %17 = arith.addf %12, %16 : vector<48x288xf32>
    %c0_16 = arith.constant 0 : index
    %c2 = arith.constant 2 : index
    %18 = vector.load %arg4[%c0_16, %c2] : memref<48x9xf32, #tpu.memory_space<vmem>>, vector<48x1xf32>
    %c0_17 = arith.constant 0 : index
    %c2_18 = arith.constant 2 : index
    %19 = vector.load %arg7[%c0_17, %c2_18] : memref<48x342xf32, #tpu.memory_space<vmem>>, vector<48x288xf32>
    %20 = vector.broadcast %18 : vector<48x1xf32> to vector<48x288xf32>
    %21 = arith.mulf %20, %19 : vector<48x288xf32>
    %22 = arith.addf %17, %21 : vector<48x288xf32>
    %c0_19 = arith.constant 0 : index
    %c3 = arith.constant 3 : index
    %23 = vector.load %arg4[%c0_19, %c3] : memref<48x9xf32, #tpu.memory_space<vmem>>, vector<48x1xf32>
    %c0_20 = arith.constant 0 : index
    %c18 = arith.constant 18 : index
    %24 = vector.load %arg7[%c0_20, %c18] : memref<48x342xf32, #tpu.memory_space<vmem>>, vector<48x288xf32>
    %25 = vector.broadcast %23 : vector<48x1xf32> to vector<48x288xf32>
    %26 = arith.mulf %25, %24 : vector<48x288xf32>
    %27 = arith.addf %22, %26 : vector<48x288xf32>
    %c0_21 = arith.constant 0 : index
    %c4 = arith.constant 4 : index
    %28 = vector.load %arg4[%c0_21, %c4] : memref<48x9xf32, #tpu.memory_space<vmem>>, vector<48x1xf32>
    %c0_22 = arith.constant 0 : index
    %c19 = arith.constant 19 : index
    %29 = vector.load %arg7[%c0_22, %c19] : memref<48x342xf32, #tpu.memory_space<vmem>>, vector<48x288xf32>
    %30 = vector.broadcast %28 : vector<48x1xf32> to vector<48x288xf32>
    %31 = arith.mulf %30, %29 : vector<48x288xf32>
    %32 = arith.addf %27, %31 : vector<48x288xf32>
    %c0_23 = arith.constant 0 : index
    %c5 = arith.constant 5 : index
    %33 = vector.load %arg4[%c0_23, %c5] : memref<48x9xf32, #tpu.memory_space<vmem>>, vector<48x1xf32>
    %c0_24 = arith.constant 0 : index
    %c20 = arith.constant 20 : index
    %34 = vector.load %arg7[%c0_24, %c20] : memref<48x342xf32, #tpu.memory_space<vmem>>, vector<48x288xf32>
    %35 = vector.broadcast %33 : vector<48x1xf32> to vector<48x288xf32>
    %36 = arith.mulf %35, %34 : vector<48x288xf32>
    %37 = arith.addf %32, %36 : vector<48x288xf32>
    %c0_25 = arith.constant 0 : index
    %c6 = arith.constant 6 : index
    %38 = vector.load %arg4[%c0_25, %c6] : memref<48x9xf32, #tpu.memory_space<vmem>>, vector<48x1xf32>
    %c0_26 = arith.constant 0 : index
    %c36 = arith.constant 36 : index
    %39 = vector.load %arg7[%c0_26, %c36] : memref<48x342xf32, #tpu.memory_space<vmem>>, vector<48x288xf32>
    %40 = vector.broadcast %38 : vector<48x1xf32> to vector<48x288xf32>
    %41 = arith.mulf %40, %39 : vector<48x288xf32>
    %42 = arith.addf %37, %41 : vector<48x288xf32>
    %c0_27 = arith.constant 0 : index
    %c7 = arith.constant 7 : index
    %43 = vector.load %arg4[%c0_27, %c7] : memref<48x9xf32, #tpu.memory_space<vmem>>, vector<48x1xf32>
    %c0_28 = arith.constant 0 : index
    %c37 = arith.constant 37 : index
    %44 = vector.load %arg7[%c0_28, %c37] : memref<48x342xf32, #tpu.memory_space<vmem>>, vector<48x288xf32>
    %45 = vector.broadcast %43 : vector<48x1xf32> to vector<48x288xf32>
    %46 = arith.mulf %45, %44 : vector<48x288xf32>
    %47 = arith.addf %42, %46 : vector<48x288xf32>
    %c0_29 = arith.constant 0 : index
    %c8 = arith.constant 8 : index
    %48 = vector.load %arg4[%c0_29, %c8] : memref<48x9xf32, #tpu.memory_space<vmem>>, vector<48x1xf32>
    %c0_30 = arith.constant 0 : index
    %c38 = arith.constant 38 : index
    %49 = vector.load %arg7[%c0_30, %c38] : memref<48x342xf32, #tpu.memory_space<vmem>>, vector<48x288xf32>
    %50 = vector.broadcast %48 : vector<48x1xf32> to vector<48x288xf32>
    %51 = arith.mulf %50, %49 : vector<48x288xf32>
    %52 = arith.addf %47, %51 : vector<48x288xf32>
    %c0_31 = arith.constant 0 : index
    %c0_32 = arith.constant 0 : index
    %53 = vector.load %arg5[%c0_31, %c0_32] : memref<1x288xf32, #tpu.memory_space<vmem>>, vector<1x288xf32>
    %cst_33 = arith.constant 5.000000e-01 : f32
    %54 = vector.broadcast %cst_33 : f32 to vector<1x288xf32>
    %55 = arith.cmpf ogt, %53, %54 : vector<1x288xf32>
    %cst_34 = arith.constant 0.000000e+00 : f32
    %56 = vector.shape_cast %55 : vector<1x288xi1> to vector<1x288xi1>
    %57 = vector.broadcast %56 : vector<1x288xi1> to vector<48x288xi1>
    %58 = vector.broadcast %cst_34 : f32 to vector<48x288xf32>
    %59 = arith.select %57, %52, %58 : vector<48x288xi1>, vector<48x288xf32>
    %c0_35 = arith.constant 0 : index
    %c0_36 = arith.constant 0 : index
    %c0_37 = arith.constant 0 : index
    %60 = vector.load %arg6[%c0_35, %c0_36, %c0_37] : memref<1x48x288xf32, #tpu.memory_space<vmem>>, vector<1x48x288xf32>
    %61 = vector.shape_cast %60 : vector<1x48x288xf32> to vector<48x288xf32>
    %62 = vector.shape_cast %59 : vector<48x288xf32> to vector<1x48x288xf32>
    tpu.vector_store %arg6[%c0_35, %c0_36, %c0_37], %62 {strides = array<i32>} : memref<1x48x288xf32, #tpu.memory_space<vmem>>, vector<1x48x288xf32>,
    return
  }
  func.func @transform_0(%arg0: i32, %arg1: i32) -> (i32, i32, i32) {
    %c0_i32 = arith.constant 0 : i32
    %c0_i32_0 = arith.constant 0 : i32
    %c0_i32_1 = arith.constant 0 : i32
    return %arg0, %c0_i32, %c0_i32_0 : i32, i32, i32
  }
  func.func @transform_1(%arg0: i32, %arg1: i32) -> (i32, i32) {
    %c0_i32 = arith.constant 0 : i32
    %c0_i32_0 = arith.constant 0 : i32
    return %arg1, %c0_i32 : i32, i32
  }
  func.func @transform_2(%arg0: i32, %arg1: i32) -> (i32, i32) {
    %c0_i32 = arith.constant 0 : i32
    %c0_i32_0 = arith.constant 0 : i32
    return %arg1, %c0_i32 : i32, i32
  }
  func.func @transform_3(%arg0: i32, %arg1: i32) -> (i32, i32) {
    %c0_i32 = arith.constant 0 : i32
    %c0_i32_0 = arith.constant 0 : i32
    %c0_i32_1 = arith.constant 0 : i32
    return %c0_i32, %c0_i32_0 : i32, i32
  }
  func.func @transform_4(%arg0: i32, %arg1: i32) -> (i32, i32, i32) {
    %c0_i32 = arith.constant 0 : i32
    %c0_i32_0 = arith.constant 0 : i32
    return %arg0, %arg1, %c0_i32 : i32, i32, i32
  }
}

</mosaic_0001>

<bundles_post_ra>
// kernel: channel_mhsa_forward.5
= control target key start
LH: loop header
LB: loop body
LE: loop exit
PB: predicated region body
PF: predicated region fallthrough
CT: control target
= control target key end

     0   :  { %s442_s9 = smov 0   ;;  %s444_s10 = smov 0   ;;  %s487_s0 = inlined_call_operand.vmem [shape: f32[16,16], index: 0, kind: input, shape index: {}]   ;;  %s488_s1 = inlined_call_operand.vmem [shape: f32[2,16,288], index: 1, kind: input, shape index: {}]   ;;  %s489_s2 = inlined_call_operand.vmem [shape: f32[2,16,288], index: 2, kind: output, shape index: {}]  }
   0x1   :  { %s446_s11 = smov 0  }
   0x2 LB: > { %s24_s12 = sadd.s32 1, %s421_s10  ;;  %p365_p0 = scmp.ge.s32.totalorder %s425_s11, 1  ;;  %s425_s11 = sphi %s446_s11, %s12_s11   ;;  %s421_s10 = sphi %s444_s10, %s491_s10   ;;  %s417_s9 = sphi %s442_s9, %s490_s9  }
   0x3   : > { %p26_p1 = scmp.ge.s32.totalorder %s24_s12, 2  ;;  %p133_p2 = scmp.lt.s32.totalorder %s425_s11, 3 }
   0x5   : > { %s493_s12 = smov (%p26_p1, %s24_s12), 0  ;;  %p134_p3 = pnand %p365_p0, %p133_p2 }
   0x6   : > { %p164_p4 = scmp.lt.s32.totalorder (!%p134_p3), %s417_s9, 1 }
   0x7   : > { %137 = sbr.rel (%p134_p3) target bundleno = 161 (0xa1), region = 28 }
   0xc   : > { %s495_s9 = smov (!%p164_p4, %s417_s9), 1  ;;  %v183_v3 = vld [vmem:[%s487_s0] sm:$0xff]  ;;  %vm191_vm0 = vcmask 130048   ;;  %v184_v7 = vld [vmem:[%s487_s0 + $0x8] sm:$0xff]  ;;  %vm269_vm1 = vcmask 261120  }
   0xd   : > { %s378_s13 = smul.u32 48, %s495_s9 }
   0xf   : > { %s171_s16 = scalar_lea.vmem %s488_s1, %s378_s13  ;;  %s181_s23 = scalar_lea.vmem %s489_s2, %s378_s13 }
  0x10   : > { %v190_v0 = vld [vmem:[%s171_s16 + $0x28] sm:$0xff]  ;;  %v187_v1 = vld [vmem:[%s171_s16 + $0x10] sm:$0xff]  ;;  %v189_v2 = vld [vmem:[%s171_s16 + $0x20] sm:$0xff] }
  0x11   : > { %258 = vmatpush.msra.mxu2 %v190_v0  ;;  %235 = vmatpush.msra.mxu1 %v189_v2  ;;  %v188_v4 = vld [vmem:[%s171_s16 + $0x18] sm:$0xff]  ;;  %v186_v5 = vld [vmem:[%s171_s16 + $0x8] sm:$0xff]  ;;  %v185_v6 = vld [vmem:[%s171_s16] sm:$0xff] }
  0x12   : > { %376 = vmatpush.msra.mxu3 %v188_v4  ;;  %212 = vmatpush.msra.mxu0 %v188_v4 }
  0x13   : > { %259 = vmatpush.msra.mxu2 %v187_v1  ;;  %236 = vmatpush.msra.mxu1 %v186_v5 }
  0x14   : > { %372 = vmatmul.msk.f32.vlgmr.msra.gmra.mxu2 %vm191_vm0, %v183_v3  ;;  %370 = vmatmul.msk.f32.vlgmr.msra.gmra.mxu1 %vm191_vm0, %v183_v3 }
  0x15   : > { %377 = vmatpush.msra.mxu3 %v185_v6  ;;  %213 = vmatpush.msra.mxu0 %v185_v6 }
  0x16   : > { %369 = vmatmul.msk.f32.vlgmr.msra.gmra.mxu3 %vm191_vm0, %v184_v7  ;;  %368 = vmatmul.msk.f32.vlgmr.msra.gmra.mxu0 %vm191_vm0, %v183_v3 }
  0x1c   : > { %373 = vmatmul.msk.f32.gmra.mxu2 %vm191_vm0, %v184_v7  ;;  %371 = vmatmul.msk.f32.gmra.mxu1 %vm191_vm0, %v184_v7 }
  0x91   : > { %v238_v8 = vpop.f32.mrf.mxu1 }
  0x92   : > { %268 = vst [vmem:[%s181_s23 + $0x8] sm:$0xff] %v238_v8 }
  0x93   : > { %v215_v9 = vpop.f32.mrf.mxu0 }
  0x94   : > { %267 = vst [vmem:[%s181_s23] sm:$0xff] %v215_v9 }
  0x97   : > { %v261_v10 = vpop.f32.mrf.mxu2 }
  0x98   : > { %270 = vst.msk [vmem:[%s181_s23 + $0x10] sm:$0xff] %vm269_vm1, %v261_v10 }
  0x99   : > { %v218_v11 = vpop.f32.mrf.mxu3  ;;  %v241_v12 = vpop.f32.mrf.mxu1 }
  0x9a   : > { %271 = vst [vmem:[%s181_s23 + $0x18] sm:$0xff] %v218_v11 }
  0x9b   : > { %272 = vst [vmem:[%s181_s23 + $0x20] sm:$0xff] %v241_v12 }
  0x9f   : > { %v264_v13 = vpop.f32.mrf.mxu2 }
  0xa0   : > { %273 = vst.msk [vmem:[%s181_s23 + $0x28] sm:$0xff] %vm269_vm1, %v264_v13 }
  0xa1 PF: > { %s12_s11 = sadd.s32 1, %s425_s11   ;;  %s490_s9 = smov %s421_s10 }
  0xa2   : > { %p9_p5 = scmp.ge.s32.totalorder %s12_s11, 4   ;;  %s491_s10 = smov %s493_s12 }
  0xa4   :  { %11 = sbr.rel (!%p9_p5) target bundleno = 2 (0x2), region = 58 }

// kernel: channel_mhsa_forward.4
= control target key start
LH: loop header
LB: loop body
LE: loop exit
PB: predicated region body
PF: predicated region fallthrough
CT: control target
= control target key end

     0   :  { %9 = vsyncpa [#allocation3], 0  ;;  %s843_s15 = smov 0   ;;  %s845_s16 = smov 0   ;;  %s936_s0 = inlined_call_operand.vmem [shape: f32[2], index: 0, kind: input, shape index: {}]   ;;  %s937_s1 = inlined_call_operand.vmem [shape: f32[2,48,288], index: 1, kind: input, shape index: {}, may-alias: {1,2,3}]   ;;  %s938_s2 = inlined_call_operand.vmem [shape: f32[2,48,288], index: 2, kind: input, shape index: {}, may-alias: {1,2,3}]   ;;  %s939_s3 = inlined_call_operand.vmem [shape: f32[2,48,288], index: 3, kind: input, shape index: {}, may-alias: {1,2,3}]   ;;  %s940_s4 = inlined_call_operand.vmem [shape: f32[2,16,288], index: 4, kind: output, shape index: {}]  }
   0x1   :  { %s847_s17 = smov 0   ;;  %s849_s18 = smov 0  }
   0x2   :  { %s851_s19 = smov 0  }
   0x3 LB: > { %s675_s20 = sadd.s32 4294967295, %s815_s19   ;;  %s24_s21 = sadd.s32 1, %s807_s17  ;;  %s815_s19 = sphi %s851_s19, %s15_s19   ;;  %s811_s18 = sphi %s849_s18, %s944_s18   ;;  %s807_s17 = sphi %s847_s17, %s943_s17   ;;  %s803_s16 = sphi %s845_s16, %s942_s16   ;;  %s799_s15 = sphi %s843_s15, %s941_s15  }
   0x4   : > { %p25_p0 = scmp.ge.s32.totalorder %s24_s21, 2  ;;  %s27_s22 = sadd.s32 1, %s811_s18 }
   0x5   : > { %p677_p1 = scmp.ge.s32.totalorder %s815_s19, 1  ;;  %p169_p2 = scmp.lt.s32.totalorder %s815_s19, 5 }
   0x6   : > { %s946_s21 = smov (%p25_p0, %s24_s21), 0  ;;  %s948_s22 = smov (!%p25_p0, %s27_s22), %s811_s18 }
   0x7   : > { %p170_p3 = pnand %p677_p1, %p169_p2  ;;  %p29_p4 = scmp.ge.s32.totalorder %s948_s22, 2 }
   0x8   : > { %p707_p5 = scmp.eq.s32.totalorder %s675_s20, 0  ;;  %s181_s25 = sshll.u32 %s936_s0, 4  ;;  %s182_s25 = int_to_ptr.vmem [resolvable:$true] %s181_s25 }
   0x9   : > { %p703_p6 = pneg %p170_p3  ;;  %s950_s22 = smov (%p29_p4, %s948_s22), 0 }
   0xa   : > { %s817_s26 = smov [#allocation2]   ;;  %234 = sbr.rel (%p170_p3) target bundleno = 720 (0x2d0), region = 36 }
   0xb   : > { %p704_p7 = pnand %p707_p5, %p703_p6 }
   0xd   : > { %706 = dma.vmem_to_smem (!%p704_p7), %s182_s25, 16, %s817_s26, [#allocation3]  }
   0xf   : > { %794 = dma.done.wait (%p707_p5), [#allocation3], 16  }
  0x10   : > { %796 = vsyncadd (%p707_p5), [#allocation3], 4294967280 }
  0x11   : > { %241 = sfence }
  0x12   : > { %p290_p8 = scmp.lt.s32.totalorder %s803_s16, 1  ;;  %s299_s27 = sadd.s32 2, %s799_s15  ;;  %vm341_vm0 = vcmask 261120   ;;  %vm451_vm7 = vcmask 64512   ;;  %vm473_vm8 = vcmask 1043456  }
  0x13   : > { %p302_p9 = scmp.lt.s32.totalorder %s299_s27, 5  ;;  %p292_p10 = scmp.lt.s32.totalorder %s799_s15, 5 }
  0x14   : > { %s952_s16 = smov (!%p290_p8, %s803_s16), 1  ;;  %s448_s23 = sld [smem:[#allocation2 + %s799_s15]] }
  0x15   : > { %s954_s27 = smov (!%p302_p9, %s299_s27), 5  ;;  %s888_s28 = smul.u32 18, %s952_s16 }
  0x16   : > { %s695_s29 = smul.u32 3, %s954_s27  ;;  %s310_s24 = sadd.s32 4, %s799_s15 }
  0x17   : > { %s293_s30 = scalar_select %p292_p10, %s799_s15, 5 }
  0x18   : > { %s306_s5 = sadd.s32 %s695_s29, %s888_s28  ;;  %p313_p11 = scmp.lt.s32.totalorder %s310_s24, 5 }
  0x19   : > { %s683_s6 = sshll.u32 %s306_s5, 3  ;;  %s693_s7 = smul.u32 3, %s293_s30 }
  0x1a   : > { %s308_s10 = scalar_lea.vmem %s938_s2, %s683_s6  ;;  %v449_v46 = vstv %s448_s23  ;;  %s956_s24 = smov (!%p313_p11, %s310_s24), 5 }
  0x1b   : > { %v334_v0 = vld [vmem:[%s308_s10] sm:$0xff]  ;;  %v335_v1 = vld [vmem:[%s308_s10 + $0x8] sm:$0xff]  ;;  %v336_v2 = vld [vmem:[%s308_s10 + $0x10] sm:$0xff]  ;;  %s296_s11 = sadd.s32 %s888_s28, %s693_s7  ;;  %s696_s25 = smul.u32 3, %s956_s24 }
  0x1c   : > { %v360_v3 = vmul.f32 %v334_v0, %v334_v0  ;;  %v361_v4 = vmul.f32 %v335_v1, %v335_v1  ;;  %v362_v5 = vmul.f32 %v336_v2, %v336_v2  ;;  %s682_s12 = sshll.u32 %s296_s11, 3  ;;  %p323_p12 = scmp.lt.s32.totalorder %s799_s15, 1 }
  0x1d   : > { %s298_s20 = scalar_lea.vmem %s937_s1, %s682_s12  ;;  %s317_s26 = sadd.s32 %s696_s25, %s888_s28 }
  0x1e   : > { %v363_v6 = vadd.f32 %v361_v4, %v360_v3  ;;  %v364_v7 = vsel %vm341_vm0, %v362_v5, 0.0  ;;  %v331_v8 = vld [vmem:[%s298_s20] sm:$0xff]  ;;  %v332_v9 = vld [vmem:[%s298_s20 + $0x8] sm:$0xff]  ;;  %v333_v10 = vld [vmem:[%s298_s20 + $0x10] sm:$0xff]  ;;  %s684_s27 = sshll.u32 %s317_s26, 3  ;;  %s958_s15 = smov (!%p323_p12, %s799_s15), 1 }
  0x1f   : > { %v337_v11 = vmul.f32 %v331_v8, %v331_v8  ;;  %v338_v12 = vmul.f32 %v332_v9, %v332_v9  ;;  %v339_v13 = vmul.f32 %v333_v10, %v333_v10  ;;  %s319_s5 = scalar_lea.vmem %s939_s3, %s684_s27  ;;  %s698_s28 = smul.u32 6, %s952_s16 }
  0x20   : > { %v365_v14 = vadd.f32 %v364_v7, %v363_v6  ;;  %v464_v55 = vld [vmem:[%s319_s5] sm:$0xff]  ;;  %v465_v56 = vld [vmem:[%s319_s5 + $0x8] sm:$0xff]  ;;  %v466_v57 = vld [vmem:[%s319_s5 + $0x10] sm:$0xff]  ;;  %s697_s6 = smul.u32 3, %s958_s15 }
  0x21   : > { %v340_v15 = vadd.f32 %v338_v12, %v337_v11  ;;  %v342_v16 = vsel %vm341_vm0, %v339_v13, 0.0  ;;  %v467_v58 = vpack.c.bf16 %v464_v55, %v464_v55  ;;  %v468_v59 = vpack.c.bf16 %v465_v56, %v465_v56 }
  0x22   : > { %366 = vadd.xlane.f32.xlu0 %v365_v14  ;;  %v469_v60 = vpack.c.bf16 %v466_v57, %v466_v57  ;;  %s327_s7 = sadd.s32 %s698_s28, %s697_s6 }
  0x23   : > { %v343_v17 = vadd.f32 %v342_v16, %v340_v15  ;;  %v475_v61 = vsel %vm473_vm8, %v467_v58, 0  ;;  %v478_v62 = vsel %vm473_vm8, %v468_v59, 0  ;;  %s685_s8 = sshll.u32 %s327_s7, 3 }
  0x24   : > { %v481_v63 = vsel %vm473_vm8, %v469_v60, 0  ;;  %490 = vmatpush.bf16.msra.mxu3 %v475_v61  ;;  %503 = vmatpush.bf16.msra.mxu0 %v478_v62  ;;  %s329_s11 = scalar_lea.vmem %s940_s4, %s685_s8 }
  0x2a   : > { %344 = vadd.xlane.f32.xlu0 %v343_v17 }
  0x95   : > { %v367_v18 = vpop.xlane.xlu0 %366 }
  0x96   : > { %v368_v19 = vmax.f32 %v367_v18, 1e-24 }
  0x98   : > { %750 = vrsqrt.f32 %v368_v19  ;;  %vm375_vm2 = vweird.f32 %v368_v19 }
  0x9d   : > { %v345_v20 = vpop.xlane.xlu0 %344 }
  0x9e   : > { %v751_v21 = vpop.eup %750  ;;  %v346_v22 = vmax.f32 %v345_v20, 1e-24 }
  0x9f   : > { %v370_v23 = vmul.f32 %v751_v21, %v368_v19  ;;  %vm376_vm1 = vweird.f32 %v751_v21 }
  0xa0   : > { %752 = vrsqrt.f32 %v346_v22  ;;  %vm377_vm3 = vmor %vm375_vm2, %vm376_vm1  ;;  %vm353_vm5 = vweird.f32 %v346_v22 }
  0xa1   : > { %v371_v24 = vmul.f32 %v751_v21, %v370_v23 }
  0xa3   : > { %v372_v25 = vmul.f32 0.5, %v371_v24 }
  0xa5   : > { %v373_v26 = vsub.f32 1.5, %v372_v25 }
  0xa6   : > { %v753_v27 = vpop.eup %752 }
  0xa7   : > { %v348_v28 = vmul.f32 %v753_v27, %v346_v22  ;;  %v374_v29 = vmul.f32 %v751_v21, %v373_v26  ;;  %vm354_vm4 = vweird.f32 %v753_v27 }
  0xa8   : > { %vm355_vm6 = vmor %vm353_vm5, %vm354_vm4 }
  0xa9   : > { %v349_v30 = vmul.f32 %v753_v27, %v348_v28  ;;  %v378_v31 = vsel %vm377_vm3, %v751_v21, %v374_v29 }
  0xaa   : > { %v379_v32 = vmul.f32 %v378_v31, %v334_v0  ;;  %v380_v33 = vmul.f32 %v378_v31, %v335_v1  ;;  %v381_v34 = vmul.f32 %v378_v31, %v336_v2 }
  0xab   : > { %v350_v35 = vmul.f32 0.5, %v349_v30 }
  0xac   : > { %403 = vmatpush.xpose.msra.mxu2 %v379_v32  ;;  %423 = vmatpush.xpose.msra.mxu1 %v380_v33 }
  0xad   : > { %v351_v36 = vsub.f32 1.5, %v350_v35 }
  0xaf   : > { %v352_v37 = vmul.f32 %v753_v27, %v351_v36 }
  0xb0   : > { %686 = vmatpush.xpose.msk.msrb.mxu2 %vm341_vm0, %v381_v34  ;;  %516 = vmatpush.bf16.msrb.mxu1 %v481_v63 }
  0xb1   : > { %v356_v38 = vsel %vm355_vm6, %v753_v27, %v352_v37 }
  0xb2   : > { %v357_v39 = vmul.f32 %v356_v38, %v331_v8  ;;  %v358_v40 = vmul.f32 %v356_v38, %v332_v9  ;;  %v359_v41 = vmul.f32 %v356_v38, %v333_v10 }
  0xb4   : > { %404 = vmatmul.f32.vlgmr.msra.gmra.mxu2 %v357_v39  ;;  %424 = vmatmul.f32.vlgmr.msra.gmra.mxu1 %v358_v40 }
  0xbc   : > { %687 = vmatmul.msk.f32.vlgmr.msrb.gmra.mxu2 %vm341_vm0, %v359_v41 }
 0x131   : > { %v425_v43 = vpop.f32.mrf.mxu1 }
 0x137   : > { %v405_v42 = vpop.f32.mrf.mxu2 }
 0x138   : > { %v426_v44 = vadd.f32 %v425_v43, %v405_v42 }
 0x13f   : > { %v445_v45 = vpop.f32.mrf.mxu2 }
 0x140   : > { %v446_v47 = vadd.f32 %v445_v45, %v426_v44 }
 0x142   : > { %v450_v48 = vmul.f32 %v449_v46, %v446_v47 }
 0x144   : > { %v452_v49 = vsel %vm451_vm7, %v450_v48, -inf }
 0x145   : > { %453 = vmax.xlane.f32.xlu1 %v452_v49 }
 0x1b8   : > { %v454_v50 = vpop.xlane.xlu1 %453 }
 0x1b9   : > { %v455_v51 = vsub.f32 %v450_v48, %v454_v50 }
 0x1bb   : > { %v456_v52 = vmul.f32 1.442695, %v455_v51 }
 0x1bd   : > { %754 = vpow2.f32 %v456_v52 }
 0x1c3   : > { %v755_v53 = vpop.eup %754 }
 0x1c4   : > { %v458_v54 = vsel %vm451_vm7, %v755_v53, 0.0 }
 0x1c5   : > { %459 = vadd.xlane.f32.xlu1 %v458_v54 }
 0x238   : > { %v460_v0 = vpop.xlane.xlu1 %459 }
 0x239   : > { %756 = vrcp.f32 %v460_v0 }
 0x23f   : > { %v757_v1 = vpop.eup %756 }
 0x240   : > { %v462_v2 = vmul.f32 %v757_v1, %v755_v53 }
 0x242   : > { %v463_v3 = vpack.c.bf16 %v462_v2, %v462_v2 }
 0x244   : > { %688 = vmatmul.msk.bf16.vlgmr.msra.gmra.mxu3 %vm451_vm7, %v463_v3  ;;  %689 = vmatmul.msk.bf16.vlgmr.msra.gmra.mxu0 %vm451_vm7, %v463_v3 }
 0x245   : > { %690 = vmatmul.msk.bf16.vlgmr.msrb.gmra.mxu1 %vm451_vm7, %v463_v3 }
 0x2c1   : > { %v505_v4 = vpop.f32.mrf.mxu0 }
 0x2c2   : > { %523 = vst [vmem:[%s329_s11 + $0x8] sm:$0xff] %v505_v4  ;;  %v518_v5 = vpop.f32.mrf.mxu1 }
 0x2c3   : > { %524 = vst.msk [vmem:[%s329_s11 + $0x10] sm:$0xff] %vm341_vm0, %v518_v5 }
 0x2c7   : > { %v492_v6 = vpop.f32.mrf.mxu3 }
 0x2c8   : > { %522 = vst [vmem:[%s329_s11] sm:$0xff] %v492_v6 }
 0x2c9   : > { %v507_v7 = vpop.f32.mrf.mxu0 }
 0x2ca   : > { %v520_v8 = vpop.f32.mrf.mxu1 }
 0x2cf   : > { %v494_v9 = vpop.f32.mrf.mxu3 }
 0x2d0 PF: > { %s15_s19 = sadd.s32 1, %s815_s19   ;;  %s941_s15 = smov %s807_s17 }
 0x2d1   : > { %p12_p13 = scmp.ge.s32.totalorder %s15_s19, 6   ;;  %s942_s16 = smov %s811_s18 }
 0x2d2   : > { %s943_s17 = smov %s946_s21  ;;  %s944_s18 = smov %s950_s22 }
 0x2d3   :  { %14 = sbr.rel (!%p12_p13) target bundleno = 3 (0x3), region = 77 }
 0x2d8   :  { %554 = vsyncpa [#allocation3], 1 }
 0x2d9   :  { %556 = vsyncpa [#allocation3 + $0x1], 1 }

// kernel: channel_mhsa_forward.3
= control target key start
LH: loop header
LB: loop body
LE: loop exit
PB: predicated region body
PF: predicated region fallthrough
CT: control target
= control target key end

     0   :  { %s2039_s15 = smov 0   ;;  %s2041_s16 = smov 0   ;;  %s3250_s0 = inlined_call_operand.vmem [shape: f32[2,16,324], index: 0, kind: input, shape index: {}]   ;;  %s3251_s1 = inlined_call_operand.vmem [shape: f32[48,16], index: 1, kind: input, shape index: {}]   ;;  %s3252_s2 = inlined_call_operand.vmem [shape: f32[48,9], index: 2, kind: input, shape index: {}]   ;;  %s3253_s3 = inlined_call_operand.vmem [shape: f32[1,288], index: 3, kind: input, shape index: {}]   ;;  %s3254_s4 = inlined_call_operand.vmem [shape: f32[2,48,288], index: 4, kind: output, shape index: {}]  }
   0x1   :  { %s2043_s17 = smov 0  }
   0x2 LB: > { %s26_s18 = sadd.s32 1, %s1990_s16  ;;  %p1848_p0 = scmp.ge.s32.totalorder %s1994_s17, 1  ;;  %s1994_s17 = sphi %s2043_s17, %s14_s17   ;;  %s1990_s16 = sphi %s2041_s16, %s3316_s16   ;;  %s1986_s15 = sphi %s2039_s15, %s3315_s15  }
   0x3   : > { %p28_p1 = scmp.ge.s32.totalorder %s26_s18, 2  ;;  %p198_p2 = scmp.lt.s32.totalorder %s1994_s17, 3 }
   0x5   : > { %s3318_s18 = smov (%p28_p1, %s26_s18), 0  ;;  %p199_p3 = pnand %p1848_p0, %p198_p2 }
   0x7   : > { %202 = sbr.rel (%p199_p3) target bundleno = 1235 (0x4d3), region = 36 }
   0xc   : > { %v2060_v0 = vld [vmem:[%s3252_s2 + $0x20] sm:$0xff]  ;;  %p239_p4 = scmp.lt.s32.totalorder %s1986_s15, 1  ;;  %v3255_v2 = vmov 0   ;;  %v2072_v3 = vld [vmem:[%s3252_s2 + $0x10] sm:$0xff]  ;;  %v2087_v4 = vld [vmem:[%s3252_s2 + $0x28] sm:$0xff]  ;;  %vm279_vm0 = vcmask 130048  }
   0xd   : > { %v2065_v1 = vld [vmem:[%s3252_s2] sm:$0xff]  ;;  %1923 = vset.pattern.permute.xlu2 %v3255_v2  ;;  %1921 = vset.pattern.permute.xlu0 %v3255_v2  ;;  %v2092_v8 = vld [vmem:[%s3252_s2 + $0x8] sm:$0xff]  ;;  %v2098_v12 = vld [vmem:[%s3252_s2 + $0x18] sm:$0xff]  ;;  %v1997_v15 = vmov 1   ;;  %v1998_v18 = vmov 2   ;;  %v1999_v21 = vmov 3  }
   0xe   : > { %1922 = vset.pattern.permute.xlu1 %v3255_v2  ;;  %475 = vperm.xlu2 %1923, %v2060_v0   ;;  %s3320_s15 = smov (!%p239_p4, %s1986_s15), 1  ;;  %v267_v13 = vld [vmem:[%s3251_s1] sm:$0xff]  ;;  %v268_v14 = vld [vmem:[%s3251_s1 + $0x8] sm:$0xff]  ;;  %v269_v16 = vld [vmem:[%s3251_s1 + $0x10] sm:$0xff]  ;;  %s2001_s26 = smov 126   ;;  %vm405_vm1 = vcmask 556032  }
   0xf   : > { %455 = vperm.xlu0 %1921, %v2065_v1   ;;  %465 = vperm.xlu1 %1922, %v2072_v3   ;;  %s1877_s25 = smul.u32 48, %s3320_s15  ;;  %v270_v17 = vld [vmem:[%s3251_s1 + $0x18] sm:$0xff]  ;;  %v271_v19 = vld [vmem:[%s3251_s1 + $0x20] sm:$0xff]  ;;  %v272_v20 = vld [vmem:[%s3251_s1 + $0x28] sm:$0xff]  ;;  %vm422_vm2 = vcmask 704032   ;;  %v2002_v47 = vmov 0.0  }
  0x10   : > { %s2003_s27 = smov 110   ;;  %vm760_vm3 = vcmask 1031168   ;;  %vm615_vm4 = vcmask 1039360   ;;  %vm905_vm5 = vcmask 900096   ;;  %vm1050_vm6 = vcmask 891904   ;;  %s2007_s29 = smov 108  }
  0x11   : > { %s243_s28 = scalar_lea.vmem %s3250_s0, %s1877_s25  ;;  %s2000_s25 = smov 127   ;;  %vm1195_vm7 = vcmask 883712   ;;  %vm1340_vm8 = vcmask 752640   ;;  %vm1485_vm9 = vcmask 744448   ;;  %vm1630_vm11 = vcmask 736256  }
  0x12   : > { %v276_v5 = vld [vmem:[%s243_s28 + $0x18] sm:$0xff]  ;;  %v277_v6 = vld [vmem:[%s243_s28 + $0x20] sm:$0xff]  ;;  %v278_v7 = vld [vmem:[%s243_s28 + $0x28] sm:$0xff]  ;;  %s2009_s20 = smov 92   ;;  %s2011_s21 = smov 91   ;;  %vm1708_vm15 = vcmask 261120  }
  0x13   : > { %312 = vmatpush.msra.mxu0 %v276_v5  ;;  %1871 = vmatpush.msra.mxu3 %v276_v5  ;;  %v273_v9 = vld [vmem:[%s243_s28] sm:$0xff]  ;;  %v274_v10 = vld [vmem:[%s243_s28 + $0x8] sm:$0xff]  ;;  %v275_v11 = vld [vmem:[%s243_s28 + $0x10] sm:$0xff]  ;;  %s2005_s28 = smov 109   ;;  %s2013_s22 = smov 90  }
  0x14   : > { %1873 = vmatpush.msra.mxu1 %v277_v6  ;;  %1875 = vmatpush.msra.mxu2 %v278_v7 }
  0x15   : > { %313 = vmatpush.msra.mxu0 %v273_v9  ;;  %1872 = vmatpush.msra.mxu3 %v273_v9 }
  0x16   : > { %480 = vperm.xlu2 %1923, %v2087_v4   ;;  %1874 = vmatpush.msra.mxu1 %v274_v10 }
  0x17   : > { %460 = vperm.xlu0 %1921, %v2092_v8   ;;  %1876 = vmatpush.msra.mxu2 %v275_v11 }
  0x18   : > { %470 = vperm.xlu1 %1922, %v2098_v12   ;;  %1851 = vmatmul.msk.f32.vlgmr.msra.gmra.mxu0 %vm279_vm0, %v267_v13 }
  0x19   : > { %1852 = vmatmul.msk.f32.vlgmr.msra.gmra.mxu3 %vm279_vm0, %v268_v14  ;;  %1858 = vmatmul.msk.f32.vlgmr.msra.gmra.mxu1 %vm279_vm0, %v268_v14 }
  0x1a   : > { %1864 = vmatmul.msk.f32.vlgmr.msra.gmra.mxu2 %vm279_vm0, %v268_v14  ;;  %347 = vmatpush.msrb.mxu0 %v277_v6 }
  0x1c   : > { %348 = vmatpush.msrb.mxu0 %v274_v10 }
  0x1e   : > { %1926 = vset.pattern.permute.xlu2 %v1997_v15  ;;  %382 = vmatpush.msra.mxu0 %v278_v7 }
  0x1f   : > { %1924 = vset.pattern.permute.xlu0 %v1997_v15  ;;  %528 = vperm.xlu2 %1926, %v2072_v3  }
  0x20   : > { %520 = vperm.xlu0 %1924, %v2065_v1   ;;  %383 = vmatpush.msra.mxu0 %v275_v11 }
  0x21   : > { %1925 = vset.pattern.permute.xlu1 %v1997_v15  ;;  %1857 = vmatmul.msk.f32.vlgmr.msrb.gmra.mxu0 %vm279_vm0, %v267_v13 }
  0x22   : > { %1853 = vmatmul.msk.f32.gmra.mxu3 %vm279_vm0, %v269_v16  ;;  %1859 = vmatmul.msk.f32.gmra.mxu1 %vm279_vm0, %v269_v16 }
  0x23   : > { %1865 = vmatmul.msk.f32.gmra.mxu2 %vm279_vm0, %v269_v16  ;;  %524 = vperm.xlu1 %1925, %v2092_v8  }
  0x27   : > { %536 = vperm.xlu2 %1926, %v2060_v0  }
  0x28   : > { %540 = vperm.xlu0 %1924, %v2087_v4  }
  0x29   : > { %1863 = vmatmul.msk.f32.vlgmr.msra.gmra.mxu0 %vm279_vm0, %v267_v13 }
  0x2a   : > { %1854 = vmatmul.msk.f32.gmra.mxu3 %vm279_vm0, %v270_v17  ;;  %1860 = vmatmul.msk.f32.gmra.mxu1 %vm279_vm0, %v270_v17 }
  0x2b   : > { %1866 = vmatmul.msk.f32.gmra.mxu2 %vm279_vm0, %v270_v17  ;;  %532 = vperm.xlu1 %1925, %v2098_v12  }
  0x2f   : > { %1928 = vset.pattern.permute.xlu2 %v1998_v18 }
  0x30   : > { %1929 = vset.pattern.permute.xlu0 %v1998_v18  ;;  %669 = vperm.xlu2 %1928, %v2092_v8  }
  0x31   : > { %673 = vperm.xlu0 %1929, %v2072_v3  }
  0x32   : > { %1855 = vmatmul.msk.f32.gmra.mxu3 %vm279_vm0, %v271_v19  ;;  %1861 = vmatmul.msk.f32.gmra.mxu1 %vm279_vm0, %v271_v19 }
  0x33   : > { %1867 = vmatmul.msk.f32.gmra.mxu2 %vm279_vm0, %v271_v19  ;;  %1927 = vset.pattern.permute.xlu1 %v1998_v18 }
  0x34   : > { %665 = vperm.xlu1 %1927, %v2065_v1  }
  0x38   : > { %681 = vperm.xlu2 %1928, %v2060_v0  }
  0x39   : > { %1931 = vset.pattern.permute.xlu0 %v1999_v21 }
  0x3a   : > { %1856 = vmatmul.msk.f32.gmra.mxu3 %vm279_vm0, %v272_v20  ;;  %1862 = vmatmul.msk.f32.gmra.mxu1 %vm279_vm0, %v272_v20 }
  0x3b   : > { %1868 = vmatmul.msk.f32.gmra.mxu2 %vm279_vm0, %v272_v20  ;;  %814 = vperm.xlu0 %1931, %v2092_v8  }
  0x3c   : > { %677 = vperm.xlu1 %1927, %v2098_v12  }
  0x40   : > { %1930 = vset.pattern.permute.xlu2 %v1999_v21 }
  0x41   : > { %810 = vperm.xlu2 %1930, %v2065_v1  }
  0x44   : > { %685 = vperm.xlu1 %1927, %v2087_v4  }
  0x49   : > { %822 = vperm.xlu2 %1930, %v2098_v12  }
  0x4c   : > { %1932 = vset.pattern.permute.xlu1 %v1999_v21 }
  0x4d   : > { %818 = vperm.xlu1 %1932, %v2072_v3  }
  0x51   : > { %830 = vperm.xlu2 %1930, %v2087_v4  }
  0x55   : > { %826 = vperm.xlu1 %1932, %v2060_v0  }
  0x68   : > { %v2156_v22 = vpop.permute.xlu2 %475 }
  0x70   : > { %v2158_v23 = vpop.permute.xlu2 %480 }
  0x79   : > { %v2160_v24 = vpop.permute.xlu2 %528 }
  0x81   : > { %v2162_v25 = vpop.permute.xlu0 %455  ;;  %v2164_v26 = vpop.permute.xlu2 %536 }
  0x82   : > { %v2166_v27 = vpop.permute.xlu1 %465 }
  0x89   : > { %v2168_v28 = vpop.permute.xlu0 %460 }
  0x8a   : > { %3268 = vst [vmem:[#allocation3_spill] sm:$0xff] %v2168_v28  ;;  %v2170_v29 = vpop.permute.xlu2 %669  ;;  %v2172_v30 = vpop.permute.xlu1 %470 }
  0x92   : > { %v2174_v31 = vpop.permute.xlu0 %520  ;;  %v2176_v32 = vpop.permute.xlu2 %681 }
  0x95   : > { %v2178_v33 = vpop.permute.xlu1 %524  ;;  %v2180_v34 = vpop.f32.mrf.mxu0 }
  0x96   : > { %403 = vst [vmem:[#allocation2] sm:$0xff] %v2180_v34  ;;  %v2183_v35 = vpop.f32.mrf.mxu1  ;;  %v543_v36 = vmul.f32 %v2174_v31, %v2180_v34 }
  0x97   : > { %408 = vst [vmem:[#allocation2 + $0x20] sm:$0xff] %v2183_v35  ;;  %v692_v37 = vmul.f32 %v2170_v29, %v2183_v35  ;;  %v547_v38 = vmul.f32 %v2178_v33, %v2183_v35 }
  0x98   : > { %579 = vrot.lane.b32.xlu1 %v543_v36, %s2000_s25 }
  0x99   : > { %732 = vrot.lane.b32.xlu0 %v692_v37, %s2001_s26  ;;  %587 = vrot.lane.b32.xlu2 %v547_v38, %s2000_s25 }
  0x9a   : > { %v2193_v39 = vpop.permute.xlu0 %540 }
  0x9b   : > { %v2197_v40 = vpop.permute.xlu2 %810 }
  0x9c   : > { %v2199_v41 = vpop.f32.mrf.mxu3  ;;  %v833_v45 = vmul.f32 %v2197_v40, %v2180_v34 }
  0x9d   : > { %v2201_v42 = vpop.permute.xlu1 %532  ;;  %407 = vst [vmem:[#allocation2 + $0x18] sm:$0xff] %v2199_v41  ;;  %v388_v43 = vpop.f32.mrf.mxu2  ;;  %v691_v61 = vmul.f32 %v2170_v29, %v2199_v41  ;;  %v546_v6 = vmul.f32 %v2178_v33, %v2199_v41 }
  0x9e   : > { %v2204_v44 = vpop.f32.mrf.mxu0  ;;  %409 = vst.msk [vmem:[#allocation2 + $0x28] sm:$0xff] %vm405_vm1, %v388_v43 }
  0x9f   : > { %v2209_v46 = vpop.f32.mrf.mxu1  ;;  %424 = vst.msk [vmem:[#allocation2 + $0x28] sm:$0xff] %vm422_vm2, %v2002_v47  ;;  %v544_v17 = vmul.f32 %v2174_v31, %v2204_v44  ;;  %v834_v19 = vmul.f32 %v2197_v40, %v2204_v44 }
  0xa0   : > { %404 = vst [vmem:[#allocation2 + $0x8] sm:$0xff] %v2204_v44  ;;  %v550_v21 = vmul.f32 %v2160_v24, %v2209_v46 }
  0xa1   : > { %411 = vst [vmem:[#allocation2 + $0x38] sm:$0xff] %v2209_v46  ;;  %869 = vrot.lane.b32.xlu0 %v833_v45, %s2003_s27 }
  0xa3   : > { %v2215_v48 = vpop.permute.xlu0 %673 }
  0xa4   : > { %v695_v20 = vmul.f32 %v2215_v48, %v2209_v46 }
  0xa5   : > { %v2217_v49 = vpop.f32.mrf.mxu3 }
  0xa6   : > { %410 = vst [vmem:[#allocation2 + $0x30] sm:$0xff] %v2217_v49  ;;  %v391_v50 = vpop.f32.mrf.mxu2  ;;  %v2220_v51 = vpop.permute.xlu1 %665  ;;  %v2247_v62 = vld [vmem:[#allocation2 + $0x28] sm:$0xff]  ;;  %v694_v37 = vmul.f32 %v2215_v48, %v2217_v49  ;;  %v549_v43 = vmul.f32 %v2160_v24, %v2217_v49 }
  0xa7   : > { %412 = vst.msk [vmem:[#allocation2 + $0x40] sm:$0xff] %vm405_vm1, %v391_v50  ;;  %v2223_v52 = vpop.f32.mrf.mxu1  ;;  %v385_v53 = vpop.f32.mrf.mxu0  ;;  %v688_v54 = vmul.f32 %v2220_v51, %v2180_v34  ;;  %v548_v7 = vmul.f32 %v2178_v33, %v2247_v62  ;;  %v693_v15 = vmul.f32 %v2170_v29, %v2247_v62  ;;  %v689_v16 = vmul.f32 %v2220_v51, %v2204_v44 }
  0xa8   : > { %425 = vst.msk [vmem:[#allocation2 + $0x40] sm:$0xff] %vm422_vm2, %v2002_v47 }
  0xa9   : > { %414 = vst [vmem:[#allocation2 + $0x50] sm:$0xff] %v2223_v52  ;;  %724 = vrot.lane.b32.xlu2 %v688_v54, %s2001_s26  ;;  %v553_v54 = vmul.f32 %v2201_v42, %v2223_v52 }
  0xaa   : > { %406 = vst.msk [vmem:[#allocation2 + $0x10] sm:$0xff] %vm405_vm1, %v385_v53 }
  0xab   : > { %423 = vst.msk [vmem:[#allocation2 + $0x10] sm:$0xff] %vm422_vm2, %v2002_v47 }
  0xad   : > { %v2232_v55 = vpop.f32.mrf.mxu3  ;;  %v815_v56 = vpop.permute.xlu0 %814 }
  0xae   : > { %413 = vst [vmem:[#allocation2 + $0x48] sm:$0xff] %v2232_v55  ;;  %v394_v57 = vpop.f32.mrf.mxu2  ;;  %v837_v58 = vmul.f32 %v815_v56, %v2183_v35  ;;  %v836_v59 = vmul.f32 %v815_v56, %v2199_v41  ;;  %v838_v9 = vmul.f32 %v815_v56, %v2247_v62  ;;  %v678_v11 = vpop.permute.xlu1 %677 }
  0xaf   : > { %415 = vst.msk [vmem:[#allocation2 + $0x58] sm:$0xff] %vm405_vm1, %v394_v57  ;;  %v2238_v60 = vpop.f32.mrf.mxu1  ;;  %v2297_v38 = vld [vmem:[#allocation2 + $0x40] sm:$0xff]  ;;  %v698_v53 = vmul.f32 %v678_v11, %v2223_v52 }
  0xb0   : > { %426 = vst.msk [vmem:[#allocation2 + $0x58] sm:$0xff] %vm422_vm2, %v2002_v47  ;;  %877 = vrot.lane.b32.xlu1 %v837_v58, %s2003_s27  ;;  %875 = vrot.lane.b32.xlu0 %v836_v59, %s2003_s27  ;;  %v551_v45 = vmul.f32 %v2160_v24, %v2297_v38  ;;  %v696_v50 = vmul.f32 %v2215_v48, %v2297_v38  ;;  %v823_v48 = vpop.permute.xlu2 %822 }
  0xb1   : > { %417 = vst [vmem:[#allocation2 + $0x68] sm:$0xff] %v2238_v60  ;;  %730 = vrot.lane.b32.xlu2 %v691_v61, %s2001_s26  ;;  %v552_v61 = vmul.f32 %v2201_v42, %v2232_v55 }
  0xb2   : > { %v2315_v24 = vld [vmem:[#allocation2 + $0x10] sm:$0xff] }
  0xb3   : > { %v690_v56 = vmul.f32 %v2220_v51, %v2315_v24  ;;  %v545_v57 = vmul.f32 %v2174_v31, %v2315_v24  ;;  %v835_v58 = vmul.f32 %v2197_v40, %v2315_v24  ;;  %v697_v31 = vmul.f32 %v678_v11, %v2232_v55 }
  0xb5   : > { %v2249_v63 = vpop.f32.mrf.mxu3 }
  0xb6   : > { %416 = vst [vmem:[#allocation2 + $0x60] sm:$0xff] %v2249_v63  ;;  %v397_v5 = vpop.f32.mrf.mxu2  ;;  %v2279_v18 = vpop.permute.xlu1 %685 }
  0xb7   : > { %418 = vst.msk [vmem:[#allocation2 + $0x70] sm:$0xff] %vm405_vm1, %v397_v5  ;;  %v2259_v10 = vpop.f32.mrf.mxu1  ;;  %v2326_v59 = vld [vmem:[#allocation2 + $0x58] sm:$0xff] }
  0xb8   : > { %427 = vst.msk [vmem:[#allocation2 + $0x70] sm:$0xff] %vm422_vm2, %v2002_v47  ;;  %585 = vrot.lane.b32.xlu1 %v546_v6, %s2000_s25  ;;  %589 = vrot.lane.b32.xlu0 %v548_v7, %s2000_s25  ;;  %v554_v51 = vmul.f32 %v2201_v42, %v2326_v59  ;;  %v2335_v40 = vpop.permute.xlu2 %830  ;;  %v699_v5 = vmul.f32 %v678_v11, %v2326_v59 }
  0xb9   : > { %420 = vst [vmem:[#allocation2 + $0x80] sm:$0xff] %v2259_v10  ;;  %879 = vrot.lane.b32.xlu2 %v838_v9, %s2003_s27  ;;  %v701_v6 = vmul.f32 %v2176_v32, %v2238_v60  ;;  %v556_v7 = vmul.f32 %v2164_v26, %v2238_v60 }
  0xbd   : > { %v2265_v13 = vpop.f32.mrf.mxu3 }
  0xbe   : > { %419 = vst [vmem:[#allocation2 + $0x78] sm:$0xff] %v2265_v13  ;;  %v400_v14 = vpop.f32.mrf.mxu2 }
  0xbf   : > { %421 = vst.msk [vmem:[#allocation2 + $0x88] sm:$0xff] %vm405_vm1, %v400_v14  ;;  %v819_v29 = vpop.permute.xlu1 %818  ;;  %v2348_v9 = vld [vmem:[#allocation2 + $0x70] sm:$0xff]  ;;  %v555_v14 = vmul.f32 %v2164_v26, %v2249_v63 }
  0xc0   : > { %428 = vst.msk [vmem:[#allocation2 + $0x88] sm:$0xff] %vm422_vm2, %v2002_v47  ;;  %734 = vrot.lane.b32.xlu1 %v693_v15, %s2001_s26  ;;  %726 = vrot.lane.b32.xlu0 %v689_v16, %s2001_s26  ;;  %v839_v33 = vmul.f32 %v819_v29, %v2217_v49  ;;  %v840_v36 = vmul.f32 %v819_v29, %v2209_v46 }
  0xc1   : > { %581 = vrot.lane.b32.xlu2 %v544_v17, %s2000_s25  ;;  %v841_v47 = vmul.f32 %v819_v29, %v2297_v38  ;;  %v557_v11 = vmul.f32 %v2164_v26, %v2348_v9  ;;  %v700_v15 = vmul.f32 %v2176_v32, %v2249_v63  ;;  %v702_v17 = vmul.f32 %v2176_v32, %v2348_v9 }
  0xc2   : > { %v559_v26 = vmul.f32 %v2193_v39, %v2259_v10  ;;  %v558_v29 = vmul.f32 %v2193_v39, %v2265_v13 }
  0xc8   : > { %871 = vrot.lane.b32.xlu1 %v834_v19, %s2003_s27  ;;  %738 = vrot.lane.b32.xlu0 %v695_v20, %s2001_s26  ;;  %v704_v19 = vmul.f32 %v2279_v18, %v2259_v10 }
  0xc9   : > { %593 = vrot.lane.b32.xlu2 %v550_v21, %s2000_s25  ;;  %v2372_v21 = vld [vmem:[#allocation2 + $0x88] sm:$0xff] }
  0xca   : > { %v560_v32 = vmul.f32 %v2193_v39, %v2372_v21  ;;  %v705_v39 = vmul.f32 %v2279_v18, %v2372_v21 }
  0xd0   : > { %883 = vrot.lane.b32.xlu1 %v840_v36, %s2003_s27  ;;  %881 = vrot.lane.b32.xlu0 %v839_v33, %s2003_s27  ;;  %v703_v33 = vmul.f32 %v2279_v18, %v2265_v13  ;;  %v2004_v36 = vmov 4  }
  0xd1   : > { %736 = vrot.lane.b32.xlu2 %v694_v37, %s2001_s26  ;;  %1933 = vset.pattern.permute.xlu0 %v2004_v36 }
  0xd2   : > { %1935 = vset.pattern.permute.xlu2 %v2004_v36  ;;  %1934 = vset.pattern.permute.xlu1 %v2004_v36 }
  0xd8   : > { %591 = vrot.lane.b32.xlu1 %v549_v43, %s2000_s25  ;;  %595 = vrot.lane.b32.xlu0 %v551_v45, %s2000_s25  ;;  %v827_v43 = vpop.permute.xlu1 %826 }
  0xd9   : > { %885 = vrot.lane.b32.xlu2 %v841_v47, %s2003_s27  ;;  %v842_v47 = vmul.f32 %v823_v48, %v2232_v55  ;;  %v845_v18 = vmul.f32 %v827_v43, %v2249_v63 }
  0xe0   : > { %740 = vrot.lane.b32.xlu1 %v696_v50, %s2001_s26  ;;  %744 = vrot.lane.b32.xlu0 %v698_v53, %s2001_s26  ;;  %v844_v50 = vmul.f32 %v823_v48, %v2326_v59 }
  0xe1   : > { %599 = vrot.lane.b32.xlu2 %v553_v54, %s2000_s25 }
  0xe8   : > { %728 = vrot.lane.b32.xlu1 %v690_v56, %s2001_s26  ;;  %583 = vrot.lane.b32.xlu0 %v545_v57, %s2000_s25  ;;  %v843_v57 = vmul.f32 %v823_v48, %v2223_v52  ;;  %v848_v48 = vmul.f32 %v2335_v40, %v2265_v13 }
  0xe9   : > { %873 = vrot.lane.b32.xlu2 %v835_v58, %s2003_s27  ;;  %v847_v58 = vmul.f32 %v827_v43, %v2348_v9 }
  0xf0   : > { %597 = vrot.lane.b32.xlu1 %v552_v61, %s2000_s25  ;;  %601 = vrot.lane.b32.xlu0 %v554_v51, %s2000_s25 }
  0xf1   : > { %742 = vrot.lane.b32.xlu2 %v697_v31, %s2001_s26 }
  0xf3   : > { %v2346_v42 = vpop.permute.xlu2 %587 }
  0xf4   : > { %3269 = vst [vmem:[#allocation4_spill] sm:$0xff] %v2346_v42  ;;  %v494_v42 = vmul.f32 %v2172_v30, %v2326_v59 }
  0xf8   : > { %746 = vrot.lane.b32.xlu1 %v699_v5, %s2001_s26  ;;  %750 = vrot.lane.b32.xlu0 %v701_v6, %s2001_s26  ;;  %v846_v5 = vmul.f32 %v827_v43, %v2238_v60  ;;  %v850_v6 = vmul.f32 %v2335_v40, %v2372_v21 }
  0xf9   : > { %605 = vrot.lane.b32.xlu2 %v556_v7, %s2000_s25 }
 0x100   : > { %603 = vrot.lane.b32.xlu1 %v555_v14, %s2000_s25  ;;  %607 = vrot.lane.b32.xlu0 %v557_v11, %s2000_s25 }
 0x101   : > { %748 = vrot.lane.b32.xlu2 %v700_v15, %s2001_s26  ;;  %v849_v15 = vmul.f32 %v2335_v40, %v2259_v10 }
 0x103   : > { %v2359_v16 = vpop.permute.xlu2 %724 }
 0x104   : > { %3270 = vst [vmem:[#allocation5_spill] sm:$0xff] %v2359_v16 }
 0x108   : > { %752 = vrot.lane.b32.xlu1 %v702_v17, %s2001_s26  ;;  %756 = vrot.lane.b32.xlu0 %v704_v19, %s2001_s26 }
 0x109   : > { %611 = vrot.lane.b32.xlu2 %v559_v26, %s2000_s25 }
 0x10a   : > { %v2396_v54 = vpop.permute.xlu1 %579 }
 0x10b   : > { %v2370_v20 = vpop.permute.xlu2 %730  ;;  %v2382_v37 = vpop.permute.xlu0 %732  ;;  %3275 = vst [vmem:[#allocation10_spill] sm:$0xff] %v2396_v54 }
 0x10c   : > { %3271 = vst [vmem:[#allocation6_spill] sm:$0xff] %v2370_v20  ;;  %v493_v20 = vmul.f32 %v2172_v30, %v2223_v52 }
 0x10d   : > { %3272 = vst [vmem:[#allocation7_spill] sm:$0xff] %v2382_v37 }
 0x110   : > { %609 = vrot.lane.b32.xlu1 %v558_v29, %s2000_s25  ;;  %613 = vrot.lane.b32.xlu0 %v560_v32, %s2000_s25  ;;  %s1878_s25 = smul.u32 144, %s3320_s15 }
 0x111   : > { %754 = vrot.lane.b32.xlu2 %v703_v33, %s2001_s26 }
 0x112   : > { %s3149_s15 = scalar_lea.vmem %s3254_s4, %s1878_s25 }
 0x113   : > { %v2385_v45 = vpop.permute.xlu2 %879  ;;  %v2393_v53 = vpop.permute.xlu0 %869 }
 0x114   : > { %3273 = vst [vmem:[#allocation8_spill] sm:$0xff] %v2385_v45 }
 0x115   : > { %3274 = vst [vmem:[#allocation9_spill] sm:$0xff] %v2393_v53 }
 0x118   : > { %758 = vrot.lane.b32.xlu1 %v705_v39, %s2001_s26  ;;  %887 = vrot.lane.b32.xlu0 %v842_v47, %s2003_s27 }
 0x119   : > { %891 = vrot.lane.b32.xlu2 %v844_v50, %s2003_s27 }
 0x11b   : > { %v2398_v56 = vpop.permute.xlu2 %581 }
 0x120   : > { %889 = vrot.lane.b32.xlu1 %v843_v57, %s2003_s27  ;;  %893 = vrot.lane.b32.xlu0 %v845_v18, %s2003_s27 }
 0x121   : > { %897 = vrot.lane.b32.xlu2 %v847_v58, %s2003_s27 }
 0x122   : > { %v2406_v61 = vpop.permute.xlu1 %877  ;;  %v2408_v51 = vpop.permute.xlu0 %875 }
 0x123   : > { %3276 = vst [vmem:[#allocation11_spill] sm:$0xff] %v2406_v61  ;;  %v2410_v31 = vpop.permute.xlu2 %593 }
 0x124   : > { %3277 = vst [vmem:[#allocation12_spill] sm:$0xff] %v2408_v51 }
 0x128   : > { %895 = vrot.lane.b32.xlu1 %v846_v5, %s2003_s27  ;;  %899 = vrot.lane.b32.xlu0 %v848_v48, %s2003_s27 }
 0x129   : > { %903 = vrot.lane.b32.xlu2 %v850_v6, %s2003_s27 }
 0x12a   : > { %v2420_v7 = vpop.permute.xlu1 %585  ;;  %v2422_v14 = vpop.permute.xlu0 %589 }
 0x12b   : > { %3278 = vst [vmem:[#allocation13_spill] sm:$0xff] %v2420_v7  ;;  %v2424_v11 = vpop.permute.xlu2 %736 }
 0x12c   : > { %3279 = vst [vmem:[#allocation14_spill] sm:$0xff] %v2422_v14 }
 0x12d   : > { %3280 = vst [vmem:[#allocation15_spill] sm:$0xff] %v2424_v11 }
 0x130   : > { %901 = vrot.lane.b32.xlu1 %v849_v15, %s2003_s27  ;;  %955 = vperm.xlu0 %1933, %v2065_v1  }
 0x131   : > { %963 = vperm.xlu2 %1935, %v2072_v3  }
 0x132   : > { %v2431_v17 = vpop.permute.xlu1 %734  ;;  %v2433_v19 = vpop.permute.xlu0 %726 }
 0x133   : > { %3281 = vst [vmem:[#allocation16_spill] sm:$0xff] %v2431_v17  ;;  %v2435_v26 = vpop.permute.xlu2 %885 }
 0x134   : > { %3282 = vst [vmem:[#allocation17_spill] sm:$0xff] %v2435_v26  ;;  %v495_v26 = vmul.f32 %v2156_v22, %v2249_v63 }
 0x138   : > { %959 = vperm.xlu1 %1934, %v2092_v8   ;;  %975 = vperm.xlu0 %1933, %v2087_v4  }
 0x139   : > { %971 = vperm.xlu2 %1935, %v2060_v0  }
 0x13a   : > { %v2440_v29 = vpop.permute.xlu1 %871  ;;  %v2442_v40 = vpop.permute.xlu0 %738 }
 0x13b   : > { %3283 = vst [vmem:[#allocation18_spill] sm:$0xff] %v2442_v40  ;;  %v2444_v32 = vpop.permute.xlu2 %599 }
 0x140   : > { %967 = vperm.xlu1 %1934, %v2098_v12  }
 0x142   : > { %v2447_v33 = vpop.permute.xlu1 %883  ;;  %v2449_v36 = vpop.permute.xlu0 %881 }
 0x143   : > { %3284 = vst [vmem:[#allocation19_spill] sm:$0xff] %v2447_v33  ;;  %v2451_v43 = vpop.permute.xlu2 %873 }
 0x144   : > { %3285 = vst [vmem:[#allocation20_spill] sm:$0xff] %v2449_v36 }
 0x14a   : > { %v2453_v39 = vpop.permute.xlu1 %591  ;;  %v2455_v47 = vpop.permute.xlu0 %595 }
 0x14b   : > { %3286 = vst [vmem:[#allocation21_spill] sm:$0xff] %v2455_v47  ;;  %v743_v50 = vpop.permute.xlu2 %742 }
 0x152   : > { %v2457_v57 = vpop.permute.xlu1 %740  ;;  %v745_v18 = vpop.permute.xlu0 %744 }
 0x153   : > { %3287 = vst [vmem:[#allocation22_spill] sm:$0xff] %v2457_v57  ;;  %v2460_v58 = vsel %vm760_vm3, %v743_v50, %v745_v18  ;;  %v606_v5 = vpop.permute.xlu2 %605 }
 0x15a   : > { %v2462_v48 = vpop.permute.xlu1 %728  ;;  %v2464_v6 = vpop.permute.xlu0 %583 }
 0x15b   : > { %v749_v15 = vpop.permute.xlu2 %748 }
 0x162   : > { %v598_v2 = vpop.permute.xlu1 %597  ;;  %v602_v51 = vpop.permute.xlu0 %601 }
 0x163   : > { %v612_v61 = vpop.permute.xlu2 %611  ;;  %v623_v45 = vsel %vm615_vm4, %v2444_v32, %v602_v51  ;;  %v657_v16 = vadd.f32 %v602_v51, %v494_v42  ;;  %v496_v42 = vmul.f32 %v2156_v22, %v2238_v60 }
 0x164   : > { %v656_v37 = vadd.f32 %v623_v45, %v493_v20 }
 0x16a   : > { %v747_v17 = vpop.permute.xlu1 %746  ;;  %v751_v50 = vpop.permute.xlu0 %750 }
 0x16b   : > { %v768_v14 = vsel %vm760_vm3, %v745_v18, %v747_v17  ;;  %v755_v28 = vpop.permute.xlu2 %754  ;;  %v769_v53 = vsel %vm760_vm3, %v749_v15, %v751_v50  ;;  %v802_v54 = vadd.f32 %v747_v17, %v657_v16 }
 0x16c   : > { %v801_v7 = vadd.f32 %v768_v14, %v656_v37  ;;  %v497_v37 = vmul.f32 %v2156_v22, %v2348_v9 }
 0x172   : > { %v604_v36 = vpop.permute.xlu1 %603  ;;  %v608_v33 = vpop.permute.xlu0 %607 }
 0x173   : > { %v624_v20 = vsel %vm615_vm4, %v604_v36, %v606_v5  ;;  %v892_v45 = vpop.permute.xlu2 %891  ;;  %v625_v11 = vsel %vm615_vm4, %v606_v5, %v608_v33  ;;  %v660_v16 = vadd.f32 %v608_v33, %v497_v37 }
 0x174   : > { %v658_v18 = vadd.f32 %v624_v20, %v495_v26  ;;  %v2478_v40 = vadd.f32 %v892_v45, %v802_v54  ;;  %v659_v51 = vadd.f32 %v625_v11, %v496_v42 }
 0x176   : > { %v803_v15 = vadd.f32 %v769_v53, %v658_v18  ;;  %v498_v53 = vmul.f32 %v2158_v23, %v2265_v13 }
 0x17a   : > { %v753_v14 = vpop.permute.xlu1 %752  ;;  %v757_v17 = vpop.permute.xlu0 %756 }
 0x17b   : > { %v770_v57 = vsel %vm760_vm3, %v751_v50, %v753_v14  ;;  %v805_v36 = vadd.f32 %v753_v14, %v660_v16  ;;  %v771_v47 = vsel %vm760_vm3, %v755_v28, %v757_v17  ;;  %v898_v26 = vpop.permute.xlu2 %897  ;;  %v500_v50 = vmul.f32 %v2158_v23, %v2372_v21 }
 0x17c   : > { %v804_v5 = vadd.f32 %v770_v57, %v659_v51  ;;  %v499_v28 = vmul.f32 %v2158_v23, %v2259_v10  ;;  %v622_v14 = vsel %vm615_vm4, %v598_v2, %v2444_v32 }
 0x17d   : > { %v2486_v54 = vadd.f32 %v898_v26, %v805_v36 }
 0x182   : > { %v610_v20 = vpop.permute.xlu1 %609  ;;  %v614_v18 = vpop.permute.xlu0 %613 }
 0x183   : > { %v626_v22 = vsel %vm615_vm4, %v610_v20, %v612_v61  ;;  %v627_v11 = vsel %vm615_vm4, %v612_v61, %v614_v18  ;;  %v663_v57 = vadd.f32 %v614_v18, %v500_v50  ;;  %v492_v61 = vmul.f32 %v2172_v30, %v2232_v55 }
 0x184   : > { %v661_v33 = vadd.f32 %v626_v22, %v498_v53  ;;  %v662_v42 = vadd.f32 %v627_v11, %v499_v28 }
 0x186   : > { %v806_v37 = vadd.f32 %v771_v47, %v661_v33  ;;  %v904_v47 = vpop.permute.xlu2 %903  ;;  %v655_v33 = vadd.f32 %v622_v14, %v492_v61 }
 0x188   : > { %v800_v23 = vadd.f32 %v2460_v58, %v655_v33 }
 0x18a   : > { %v759_v16 = vpop.permute.xlu1 %758  ;;  %v888_v51 = vpop.permute.xlu0 %887 }
 0x18b   : > { %v772_v36 = vsel %vm760_vm3, %v757_v17, %v759_v16  ;;  %v808_v20 = vadd.f32 %v759_v16, %v663_v57 }
 0x18c   : > { %v807_v53 = vadd.f32 %v772_v36, %v662_v42 }
 0x18d   : > { %v2501_v22 = vadd.f32 %v904_v47, %v808_v20 }
 0x192   : > { %v890_v18 = vpop.permute.xlu1 %889  ;;  %v894_v11 = vpop.permute.xlu0 %893 }
 0x193   : > { %v912_v50 = vsel %vm905_vm5, %v888_v51, %v890_v18  ;;  %v913_v2 = vsel %vm905_vm5, %v890_v18, %v892_v45 }
 0x194   : > { %v2506_v32 = vadd.f32 %v912_v50, %v800_v23  ;;  %v2508_v17 = vadd.f32 %v913_v2, %v801_v7 }
 0x19a   : > { %v896_v28 = vpop.permute.xlu1 %895  ;;  %v900_v30 = vpop.permute.xlu0 %899 }
 0x19b   : > { %v914_v57 = vsel %vm905_vm5, %v894_v11, %v896_v28  ;;  %v915_v42 = vsel %vm905_vm5, %v896_v28, %v898_v26 }
 0x19c   : > { %v2512_v16 = vadd.f32 %v914_v57, %v803_v15  ;;  %v2514_v14 = vadd.f32 %v915_v42, %v804_v5 }
 0x1a2   : > { %v902_v58 = vpop.permute.xlu1 %901  ;;  %v956_v36 = vpop.permute.xlu0 %955 }
 0x1a3   : > { %v916_v51 = vsel %vm905_vm5, %v900_v30, %v902_v58  ;;  %v917_v45 = vsel %vm905_vm5, %v902_v58, %v904_v47  ;;  %v978_v20 = vmul.f32 %v956_v36, %v2180_v34  ;;  %v979_v7 = vmul.f32 %v956_v36, %v2204_v44 }
 0x1a4   : > { %v2520_v61 = vadd.f32 %v916_v51, %v806_v37  ;;  %v2522_v33 = vadd.f32 %v917_v45, %v807_v53  ;;  %v980_v26 = vmul.f32 %v956_v36, %v2315_v24  ;;  %v2006_v37 = vmov 5   ;;  %v964_v53 = vpop.permute.xlu2 %963 }
 0x1a5   : > { %1016 = vrot.lane.b32.xlu2 %v979_v7, %s2005_s28  ;;  %1014 = vrot.lane.b32.xlu1 %v978_v20, %s2005_s28  ;;  %v986_v18 = vmul.f32 %v964_v53, %v2297_v38  ;;  %v984_v11 = vmul.f32 %v964_v53, %v2217_v49  ;;  %v985_v50 = vmul.f32 %v964_v53, %v2209_v46 }
 0x1a6   : > { %1018 = vrot.lane.b32.xlu0 %v980_v26, %s2005_s28  ;;  %1937 = vset.pattern.permute.xlu2 %v2006_v37 }
 0x1a7   : > { %1936 = vset.pattern.permute.xlu1 %v2006_v37  ;;  %1938 = vset.pattern.permute.xlu0 %v2006_v37 }
 0x1aa   : > { %v960_v15 = vpop.permute.xlu1 %959  ;;  %v976_v45 = vpop.permute.xlu0 %975 }
 0x1ab   : > { %v981_v5 = vmul.f32 %v960_v15, %v2199_v41  ;;  %v982_v47 = vmul.f32 %v960_v15, %v2183_v35  ;;  %v983_v23 = vmul.f32 %v960_v15, %v2247_v62  ;;  %v993_v20 = vmul.f32 %v976_v45, %v2265_v13 }
 0x1ac   : > { %v972_v42 = vpop.permute.xlu2 %971  ;;  %v994_v7 = vmul.f32 %v976_v45, %v2259_v10  ;;  %v995_v26 = vmul.f32 %v976_v45, %v2372_v21  ;;  %v485_v15 = vmul.f32 %v2162_v25, %v2315_v24  ;;  %v490_v45 = vmul.f32 %v2166_v27, %v2209_v46 }
 0x1ad   : > { %1022 = vrot.lane.b32.xlu2 %v982_v47, %s2005_s28  ;;  %1020 = vrot.lane.b32.xlu1 %v981_v5, %s2005_s28  ;;  %v990_v58 = vmul.f32 %v972_v42, %v2249_v63  ;;  %v991_v36 = vmul.f32 %v972_v42, %v2238_v60  ;;  %v992_v51 = vmul.f32 %v972_v42, %v2348_v9 }
 0x1ae   : > { %1024 = vrot.lane.b32.xlu0 %v983_v23, %s2005_s28  ;;  %v617_v5 = vsel %vm615_vm4, %v2398_v56, %v2464_v6  ;;  %v907_v23 = vsel %vm905_vm5, %v2440_v29, %v2451_v43 }
 0x1b2   : > { %v968_v2 = vpop.permute.xlu1 %967 }
 0x1b3   : > { %v987_v28 = vmul.f32 %v968_v2, %v2232_v55  ;;  %v988_v30 = vmul.f32 %v968_v2, %v2223_v52  ;;  %v989_v57 = vmul.f32 %v968_v2, %v2326_v59 }
 0x1b5   : > { %1028 = vrot.lane.b32.xlu2 %v985_v50, %s2005_s28  ;;  %1026 = vrot.lane.b32.xlu1 %v984_v11, %s2005_s28 }
 0x1b6   : > { %1030 = vrot.lane.b32.xlu0 %v986_v18, %s2005_s28 }
 0x1bd   : > { %1034 = vrot.lane.b32.xlu2 %v988_v30, %s2005_s28  ;;  %1032 = vrot.lane.b32.xlu1 %v987_v28, %s2005_s28  ;;  %v620_v30 = vsel %vm615_vm4, %v2453_v39, %v2410_v31 }
 0x1be   : > { %1036 = vrot.lane.b32.xlu0 %v989_v57, %s2005_s28  ;;  %v489_v57 = vmul.f32 %v2166_v27, %v2217_v49 }
 0x1c0   : > { %v652_v42 = vadd.f32 %v620_v30, %v489_v57 }
 0x1c5   : > { %1040 = vrot.lane.b32.xlu2 %v991_v36, %s2005_s28  ;;  %1038 = vrot.lane.b32.xlu1 %v990_v58, %s2005_s28  ;;  %v3288_v58 = vld [vmem:[#allocation21_spill] sm:$0xff] }
 0x1c6   : > { %1042 = vrot.lane.b32.xlu0 %v992_v51, %s2005_s28  ;;  %v621_v36 = vsel %vm615_vm4, %v2410_v31, %v3288_v58  ;;  %v3291_v31 = vld [vmem:[#allocation15_spill] sm:$0xff] }
 0x1cd   : > { %1046 = vrot.lane.b32.xlu2 %v994_v7, %s2005_s28  ;;  %1044 = vrot.lane.b32.xlu1 %v993_v20, %s2005_s28 }
 0x1ce   : > { %1048 = vrot.lane.b32.xlu0 %v995_v26, %s2005_s28  ;;  %v3289_v26 = vld [vmem:[#allocation22_spill] sm:$0xff] }
 0x1d5   : > { %1104 = vperm.xlu2 %1937, %v2092_v8   ;;  %1100 = vperm.xlu1 %1936, %v2065_v1   ;;  %v484_v8 = vmul.f32 %v2162_v25, %v2204_v44  ;;  %v648_v1 = vadd.f32 %v2464_v6, %v485_v15  ;;  %v3290_v15 = vld [vmem:[#allocation18_spill] sm:$0xff] }
 0x1d6   : > { %1108 = vperm.xlu0 %1938, %v2072_v3  }
 0x1d7   : > { %v647_v3 = vadd.f32 %v617_v5, %v484_v8  ;;  %v766_v5 = vsel %vm760_vm3, %v3290_v15, %v3289_v26 }
 0x1dd   : > { %1116 = vperm.xlu2 %1937, %v2060_v0   ;;  %1112 = vperm.xlu1 %1936, %v2098_v12   ;;  %v762_v0 = vsel %vm760_vm3, %v2433_v19, %v2462_v48 }
 0x1de   : > { %v792_v12 = vadd.f32 %v762_v0, %v647_v3 }
 0x1e0   : > { %v937_v6 = vadd.f32 %v907_v23, %v792_v12  ;;  %v3292_v12 = vld [vmem:[#allocation19_spill] sm:$0xff]  ;;  %v3293_v23 = vld [vmem:[#allocation20_spill] sm:$0xff] }
 0x1e5   : > { %1120 = vperm.xlu1 %1936, %v2087_v4   ;;  %v793_v4 = vadd.f32 %v2462_v48, %v648_v1  ;;  %v653_v1 = vadd.f32 %v621_v36, %v490_v45 }
 0x1e7   : > { %v938_v18 = vadd.f32 %v2451_v43, %v793_v4  ;;  %v491_v43 = vmul.f32 %v2166_v27, %v2297_v38  ;;  %v765_v27 = vsel %vm760_vm3, %v3291_v31, %v3290_v15  ;;  %v798_v4 = vadd.f32 %v766_v5, %v653_v1 }
 0x1e8   : > { %v797_v3 = vadd.f32 %v765_v27, %v652_v42 }
 0x1e9   : > { %v654_v39 = vadd.f32 %v3288_v58, %v491_v43 }
 0x1eb   : > { %v799_v0 = vadd.f32 %v3289_v26, %v654_v39 }
 0x1ff   : > { %v1017_v47 = vpop.permute.xlu2 %1016 }
 0x207   : > { %v1023_v37 = vpop.permute.xlu2 %1022 }
 0x217   : > { %v1015_v53 = vpop.permute.xlu1 %1014 }
 0x218   : > { %v2581_v11 = vsel %vm1050_vm6, %v1015_v53, %v1017_v47  ;;  %v1019_v50 = vpop.permute.xlu0 %1018  ;;  %v910_v53 = vsel %vm905_vm5, %v3293_v23, %v3292_v12 }
 0x219   : > { %v1052_v2 = vsel %vm1050_vm6, %v1017_v47, %v1019_v50  ;;  %v2584_v28 = vadd.f32 %v1019_v50, %v938_v18  ;;  %v1029_v47 = vpop.permute.xlu2 %1028  ;;  %v3294_v18 = vld [vmem:[#allocation17_spill] sm:$0xff]  ;;  %v942_v50 = vadd.f32 %v910_v53, %v797_v3 }
 0x21a   : > { %v2586_v48 = vadd.f32 %v1052_v2, %v937_v6  ;;  %v911_v6 = vsel %vm905_vm5, %v3292_v12, %v3294_v18  ;;  %v944_v2 = vadd.f32 %v3294_v18, %v799_v0 }
 0x21b   : > { %v943_v57 = vadd.f32 %v911_v6, %v798_v4 }
 0x21f   : > { %v1021_v51 = vpop.permute.xlu1 %1020 }
 0x220   : > { %v2601_v20 = vsel %vm1050_vm6, %v1021_v51, %v1023_v37  ;;  %v2603_v7 = vpop.permute.xlu0 %1024 }
 0x221   : > { %v2611_v8 = vsel %vm1050_vm6, %v1023_v37, %v2603_v7  ;;  %v1035_v45 = vpop.permute.xlu2 %1034 }
 0x227   : > { %v1027_v37 = vpop.permute.xlu1 %1026 }
 0x228   : > { %v1055_v30 = vsel %vm1050_vm6, %v1027_v37, %v1029_v47  ;;  %v1031_v43 = vpop.permute.xlu0 %1030 }
 0x229   : > { %v2625_v42 = vadd.f32 %v1055_v30, %v942_v50  ;;  %v1056_v58 = vsel %vm1050_vm6, %v1029_v47, %v1031_v43  ;;  %v2628_v36 = vadd.f32 %v1031_v43, %v944_v2  ;;  %v1041_v47 = vpop.permute.xlu2 %1040 }
 0x22a   : > { %v2630_v51 = vadd.f32 %v1056_v58, %v943_v57 }
 0x22f   : > { %v1033_v39 = vpop.permute.xlu1 %1032 }
 0x230   : > { %v1057_v26 = vsel %vm1050_vm6, %v1033_v39, %v1035_v45  ;;  %v1037_v15 = vpop.permute.xlu0 %1036 }
 0x231   : > { %v2634_v5 = vadd.f32 %v1057_v26, %v2506_v32  ;;  %v1058_v31 = vsel %vm1050_vm6, %v1035_v45, %v1037_v15  ;;  %v2638_v27 = vadd.f32 %v1037_v15, %v2478_v40  ;;  %v1047_v40 = vpop.permute.xlu2 %1046 }
 0x232   : > { %v2641_v1 = vadd.f32 %v1058_v31, %v2508_v17 }
 0x237   : > { %v1039_v3 = vpop.permute.xlu1 %1038 }
 0x238   : > { %v1059_v0 = vsel %vm1050_vm6, %v1039_v3, %v1041_v47  ;;  %v1043_v4 = vpop.permute.xlu0 %1042 }
 0x239   : > { %v2645_v12 = vadd.f32 %v1059_v0, %v2512_v16  ;;  %v1060_v23 = vsel %vm1050_vm6, %v1041_v47, %v1043_v4  ;;  %v2649_v32 = vadd.f32 %v1043_v4, %v2486_v54 }
 0x23a   : > { %v2652_v53 = vadd.f32 %v1060_v23, %v2514_v14 }
 0x23f   : > { %v1045_v18 = vpop.permute.xlu1 %1044 }
 0x240   : > { %v1061_v17 = vsel %vm1050_vm6, %v1045_v18, %v1047_v40  ;;  %v1049_v6 = vpop.permute.xlu0 %1048  ;;  %v2728_v18 = vld [vmem:[%s3252_s2 + $0x18] sm:$0xff] }
 0x241   : > { %v2656_v50 = vadd.f32 %v1061_v17, %v2520_v61  ;;  %v1062_v37 = vsel %vm1050_vm6, %v1047_v40, %v1049_v6  ;;  %v2660_v16 = vadd.f32 %v1049_v6, %v2501_v22  ;;  %v1105_v61 = vpop.permute.xlu2 %1104  ;;  %v2734_v17 = vld [vmem:[%s3252_s2 + $0x28] sm:$0xff] }
 0x242   : > { %v2663_v2 = vadd.f32 %v1062_v37, %v2522_v33  ;;  %v1128_v22 = vmul.f32 %v1105_v61, %v2247_v62  ;;  %v1127_v33 = vmul.f32 %v1105_v61, %v2183_v35  ;;  %v1126_v43 = vmul.f32 %v1105_v61, %v2199_v41 }
 0x247   : > { %v1101_v54 = vpop.permute.xlu1 %1100 }
 0x248   : > { %v1123_v14 = vmul.f32 %v1101_v54, %v2180_v34  ;;  %v1124_v30 = vmul.f32 %v1101_v54, %v2204_v44  ;;  %v1125_v57 = vmul.f32 %v1101_v54, %v2315_v24  ;;  %v2008_v44 = vmov 6   ;;  %v1109_v58 = vpop.permute.xlu0 %1108  ;;  %v3295_v54 = vld [vmem:[#allocation10_spill] sm:$0xff] }
 0x249   : > { %1940 = vset.pattern.permute.xlu0 %v2008_v44  ;;  %1939 = vset.pattern.permute.xlu2 %v2008_v44  ;;  %v1131_v45 = vmul.f32 %v1109_v58, %v2297_v38  ;;  %v1130_v39 = vmul.f32 %v1109_v58, %v2209_v46  ;;  %v1129_v26 = vmul.f32 %v1109_v58, %v2217_v49  ;;  %v1117_v46 = vpop.permute.xlu2 %1116 }
 0x24a   : > { %1163 = vrot.lane.b32.xlu1 %v1125_v57, %s2007_s29  ;;  %1161 = vrot.lane.b32.xlu0 %v1124_v30, %s2007_s29  ;;  %v1136_v49 = vmul.f32 %v1117_v46, %v2238_v60  ;;  %v1137_v0 = vmul.f32 %v1117_v46, %v2348_v9  ;;  %v1135_v4 = vmul.f32 %v1117_v46, %v2249_v63  ;;  %v2704_v60 = vld [vmem:[%s3252_s2 + $0x10] sm:$0xff]  ;;  %v2710_v63 = vld [vmem:[%s3252_s2 + $0x8] sm:$0xff]  ;;  %v3296_v57 = vld [vmem:[#allocation5_spill] sm:$0xff] }
 0x24b   : > { %1159 = vrot.lane.b32.xlu2 %v1123_v14, %s2007_s29  ;;  %1941 = vset.pattern.permute.xlu1 %v2008_v44  ;;  %v616_v14 = vsel %vm615_vm4, %v3295_v54, %v2398_v56  ;;  %v483_v30 = vmul.f32 %v2162_v25, %v2180_v34  ;;  %v761_v61 = vsel %vm760_vm3, %v3296_v57, %v2433_v19  ;;  %v3298_v44 = vld [vmem:[#allocation13_spill] sm:$0xff]  ;;  %v3301_v34 = vld [vmem:[#allocation14_spill] sm:$0xff] }
 0x24f   : > { %v1113_v15 = vpop.permute.xlu1 %1112 }
 0x250   : > { %v1133_v31 = vmul.f32 %v1113_v15, %v2223_v52  ;;  %v1134_v47 = vmul.f32 %v1113_v15, %v2326_v59  ;;  %v1132_v3 = vmul.f32 %v1113_v15, %v2232_v55 }
 0x252   : > { %1169 = vrot.lane.b32.xlu1 %v1128_v22, %s2007_s29  ;;  %1167 = vrot.lane.b32.xlu0 %v1127_v33, %s2007_s29  ;;  %v646_v33 = vadd.f32 %v616_v14, %v483_v30 }
 0x253   : > { %1165 = vrot.lane.b32.xlu2 %v1126_v43, %s2007_s29  ;;  %v3297_v43 = vld [vmem:[#allocation4_spill] sm:$0xff] }
 0x254   : > { %v618_v58 = vsel %vm615_vm4, %v3298_v44, %v3297_v43  ;;  %v791_v15 = vadd.f32 %v761_v61, %v646_v33  ;;  %v619_v19 = vsel %vm615_vm4, %v3297_v43, %v3301_v34 }
 0x257   : > { %v1121_v52 = vpop.permute.xlu1 %1120 }
 0x258   : > { %v1139_v55 = vmul.f32 %v1121_v52, %v2259_v10  ;;  %v1140_v23 = vmul.f32 %v1121_v52, %v2372_v21  ;;  %v1138_v40 = vmul.f32 %v1121_v52, %v2265_v13  ;;  %v2716_v10 = vld [vmem:[%s3252_s2] sm:$0xff] }
 0x259   : > { %v2722_v13 = vld [vmem:[%s3252_s2 + $0x20] sm:$0xff] }
 0x25a   : > { %1175 = vrot.lane.b32.xlu1 %v1131_v45, %s2007_s29  ;;  %1173 = vrot.lane.b32.xlu0 %v1130_v39, %s2007_s29  ;;  %v3299_v45 = vld [vmem:[#allocation9_spill] sm:$0xff] }
 0x25b   : > { %1171 = vrot.lane.b32.xlu2 %v1129_v26, %s2007_s29  ;;  %v906_v39 = vsel %vm905_vm5, %v3299_v45, %v2440_v29  ;;  %v3300_v26 = vld [vmem:[#allocation3_spill] sm:$0xff]  ;;  %v3302_v29 = vld [vmem:[#allocation16_spill] sm:$0xff] }
 0x25c   : > { %v486_v56 = vmul.f32 %v3300_v26, %v2199_v41  ;;  %v488_v25 = vmul.f32 %v3300_v26, %v2247_v62 }
 0x25e   : > { %v651_v46 = vadd.f32 %v3301_v34, %v488_v25 }
 0x260   : > { %v796_v54 = vadd.f32 %v3302_v29, %v651_v46 }
 0x262   : > { %1181 = vrot.lane.b32.xlu1 %v1134_v47, %s2007_s29  ;;  %1179 = vrot.lane.b32.xlu0 %v1133_v31, %s2007_s29  ;;  %v649_v31 = vadd.f32 %v618_v58, %v486_v56  ;;  %v487_v47 = vmul.f32 %v3300_v26, %v2183_v35  ;;  %v3306_v58 = vld [vmem:[#allocation11_spill] sm:$0xff] }
 0x263   : > { %1177 = vrot.lane.b32.xlu2 %v1132_v3, %s2007_s29  ;;  %v936_v3 = vadd.f32 %v906_v39, %v791_v15  ;;  %v3307_v39 = vld [vmem:[#allocation12_spill] sm:$0xff] }
 0x264   : > { %v650_v52 = vadd.f32 %v619_v19, %v487_v47 }
 0x26a   : > { %1187 = vrot.lane.b32.xlu1 %v1137_v0, %s2007_s29  ;;  %1185 = vrot.lane.b32.xlu0 %v1136_v49, %s2007_s29  ;;  %v3303_v49 = vld [vmem:[#allocation7_spill] sm:$0xff]  ;;  %v3304_v0 = vld [vmem:[#allocation6_spill] sm:$0xff] }
 0x26b   : > { %1183 = vrot.lane.b32.xlu2 %v1135_v4, %s2007_s29  ;;  %v764_v41 = vsel %vm760_vm3, %v3303_v49, %v3302_v29  ;;  %v763_v4 = vsel %vm760_vm3, %v3304_v0, %v3303_v49 }
 0x26c   : > { %v794_v61 = vadd.f32 %v763_v4, %v649_v31  ;;  %v795_v33 = vadd.f32 %v764_v41, %v650_v52 }
 0x272   : > { %1193 = vrot.lane.b32.xlu1 %v1140_v23, %s2007_s29  ;;  %1191 = vrot.lane.b32.xlu0 %v1139_v55, %s2007_s29  ;;  %v1081_v55 = vadd.f32 %v2581_v11, %v936_v3  ;;  %v3305_v11 = vld [vmem:[#allocation8_spill] sm:$0xff] }
 0x273   : > { %1189 = vrot.lane.b32.xlu2 %v1138_v40, %s2007_s29  ;;  %v909_v45 = vsel %vm905_vm5, %v3306_v58, %v3305_v11  ;;  %v941_v26 = vadd.f32 %v3305_v11, %v796_v54 }
 0x274   : > { %v940_v56 = vadd.f32 %v909_v45, %v795_v33 }
 0x275   : > { %v1086_v15 = vadd.f32 %v2603_v7, %v941_v26 }
 0x276   : > { %v1085_v34 = vadd.f32 %v2611_v8, %v940_v56 }
 0x27a   : > { %1253 = vperm.xlu1 %1941, %v2704_v60   ;;  %1249 = vperm.xlu0 %1940, %v2710_v63  }
 0x27b   : > { %1245 = vperm.xlu2 %1939, %v2716_v10  }
 0x282   : > { %1261 = vperm.xlu1 %1941, %v2722_v13  }
 0x283   : > { %1257 = vperm.xlu2 %1939, %v2728_v18  }
 0x28b   : > { %1265 = vperm.xlu2 %1939, %v2734_v17  }
 0x2a5   : > { %v1160_v6 = vpop.permute.xlu2 %1159 }
 0x2ad   : > { %v1166_v37 = vpop.permute.xlu2 %1165 }
 0x2b5   : > { %v1172_v22 = vpop.permute.xlu2 %1171 }
 0x2bc   : > { %v1164_v23 = vpop.permute.xlu1 %1163  ;;  %v1162_v40 = vpop.permute.xlu0 %1161 }
 0x2bd   : > { %v2770_v35 = vadd.f32 %v1164_v23, %v2584_v28  ;;  %v1178_v14 = vpop.permute.xlu2 %1177  ;;  %v1196_v30 = vsel %vm1195_vm7, %v1160_v6, %v1162_v40  ;;  %v1197_v57 = vsel %vm1195_vm7, %v1162_v40, %v1164_v23  ;;  %v908_v28 = vsel %vm905_vm5, %v3307_v39, %v3306_v58 }
 0x2be   : > { %v2774_v43 = vadd.f32 %v1196_v30, %v1081_v55  ;;  %v2777_v44 = vadd.f32 %v1197_v57, %v2586_v48  ;;  %v939_v6 = vadd.f32 %v908_v28, %v794_v61  ;;  %v2813_v57 = vld [vmem:[#allocation2] sm:$0xff]  ;;  %v2816_v61 = vld [vmem:[#allocation2 + $0x8] sm:$0xff] }
 0x2c0   : > { %v1084_v25 = vadd.f32 %v2601_v20, %v939_v6 }
 0x2c4   : > { %v1170_v48 = vpop.permute.xlu1 %1169  ;;  %v1168_v19 = vpop.permute.xlu0 %1167 }
 0x2c5   : > { %v2789_v31 = vadd.f32 %v1170_v48, %v1086_v15  ;;  %v1184_v47 = vpop.permute.xlu2 %1183  ;;  %v1198_v3 = vsel %vm1195_vm7, %v1166_v37, %v1168_v19  ;;  %v1199_v46 = vsel %vm1195_vm7, %v1168_v19, %v1170_v48 }
 0x2c6   : > { %v2793_v29 = vadd.f32 %v1198_v3, %v1084_v25  ;;  %v2795_v49 = vadd.f32 %v1199_v46, %v1085_v34  ;;  %v2851_v25 = vld [vmem:[#allocation2 + $0x18] sm:$0xff]  ;;  %v2854_v34 = vld [vmem:[#allocation2 + $0x20] sm:$0xff] }
 0x2c7   : > { %v2865_v46 = vld [vmem:[#allocation2 + $0x38] sm:$0xff] }
 0x2cc   : > { %v1176_v41 = vpop.permute.xlu1 %1175  ;;  %v1174_v0 = vpop.permute.xlu0 %1173 }
 0x2cd   : > { %v2798_v7 = vadd.f32 %v1176_v41, %v2628_v36  ;;  %v1190_v20 = vpop.permute.xlu2 %1189  ;;  %v1200_v8 = vsel %vm1195_vm7, %v1172_v22, %v1174_v0  ;;  %v1201_v4 = vsel %vm1195_vm7, %v1174_v0, %v1176_v41  ;;  %v2871_v0 = vld [vmem:[#allocation2 + $0x48] sm:$0xff] }
 0x2ce   : > { %v2803_v52 = vadd.f32 %v1200_v8, %v2625_v42  ;;  %v2806_v37 = vadd.f32 %v1201_v4, %v2630_v51 }
 0x2d4   : > { %v1182_v55 = vpop.permute.xlu1 %1181  ;;  %v1180_v23 = vpop.permute.xlu0 %1179 }
 0x2d5   : > { %v2809_v40 = vadd.f32 %v1182_v55, %v2638_v27  ;;  %v1246_v54 = vpop.permute.xlu2 %1245  ;;  %v1202_v36 = vsel %vm1195_vm7, %v1178_v14, %v1180_v23  ;;  %v1203_v30 = vsel %vm1195_vm7, %v1180_v23, %v1182_v55  ;;  %v2881_v23 = vld [vmem:[#allocation2 + $0x60] sm:$0xff] }
 0x2d6   : > { %v1268_v22 = vmul.f32 %v2813_v57, %v1246_v54  ;;  %v1269_v42 = vmul.f32 %v2816_v61, %v1246_v54  ;;  %v1270_v51 = vmul.f32 %v1246_v54, %v2315_v24  ;;  %v2821_v33 = vadd.f32 %v1202_v36, %v2634_v5  ;;  %v2884_v36 = vld [vmem:[#allocation2 + $0x68] sm:$0xff] }
 0x2d7   : > { %v2824_v27 = vadd.f32 %v1203_v30, %v2641_v1 }
 0x2d8   : > { %1308 = vrot.lane.b32.xlu2 %v1270_v51, %s2009_s20  ;;  %1306 = vrot.lane.b32.xlu1 %v1269_v42, %s2009_s20  ;;  %v2891_v42 = vld [vmem:[#allocation2 + $0x78] sm:$0xff] }
 0x2d9   : > { %1304 = vrot.lane.b32.xlu0 %v1268_v22, %s2009_s20 }
 0x2dc   : > { %v1188_v14 = vpop.permute.xlu1 %1187  ;;  %v1186_v11 = vpop.permute.xlu0 %1185 }
 0x2dd   : > { %v2830_v58 = vadd.f32 %v1188_v14, %v2649_v32  ;;  %v1204_v24 = vsel %vm1195_vm7, %v1184_v47, %v1186_v11  ;;  %v1205_v5 = vsel %vm1195_vm7, %v1186_v11, %v1188_v14  ;;  %v2862_v47 = vld [vmem:[#allocation2 + $0x30] sm:$0xff]  ;;  %v1258_v41 = vpop.permute.xlu2 %1257  ;;  %v2894_v14 = vld [vmem:[#allocation2 + $0x80] sm:$0xff] }
 0x2de   : > { %v2835_v45 = vadd.f32 %v1204_v24, %v2645_v12  ;;  %v2838_v1 = vadd.f32 %v1205_v5, %v2652_v53  ;;  %v1279_v4 = vmul.f32 %v1258_v41, %v2326_v59 }
 0x2e4   : > { %v1194_v39 = vpop.permute.xlu1 %1193  ;;  %v1192_v28 = vpop.permute.xlu0 %1191 }
 0x2e5   : > { %v2841_v26 = vadd.f32 %v1194_v39, %v2660_v16  ;;  %v1206_v6 = vsel %vm1195_vm7, %v1190_v20, %v1192_v28  ;;  %v1207_v32 = vsel %vm1195_vm7, %v1192_v28, %v1194_v39  ;;  %v1277_v20 = vmul.f32 %v2871_v0, %v1258_v41  ;;  %v1266_v59 = vpop.permute.xlu2 %1265 }
 0x2e6   : > { %v2846_v56 = vadd.f32 %v1206_v6, %v2656_v50  ;;  %v2849_v15 = vadd.f32 %v1207_v32, %v2663_v2  ;;  %v2010_v50 = vmov 7   ;;  %v1283_v51 = vmul.f32 %v2891_v42, %v1266_v59 }
 0x2e7   : > { %1943 = vset.pattern.permute.xlu1 %v2010_v50  ;;  %1942 = vset.pattern.permute.xlu0 %v2010_v50  ;;  %v1284_v11 = vmul.f32 %v2894_v14, %v1266_v59  ;;  %v1285_v24 = vmul.f32 %v1266_v59, %v2372_v21 }
 0x2e8   : > { %1944 = vset.pattern.permute.xlu2 %v2010_v50 }
 0x2ec   : > { %v1250_v12 = vpop.permute.xlu0 %1249  ;;  %v1254_v2 = vpop.permute.xlu1 %1253 }
 0x2ed   : > { %v1271_v53 = vmul.f32 %v2851_v25, %v1250_v12  ;;  %v1272_v16 = vmul.f32 %v2854_v34, %v1250_v12  ;;  %v1273_v48 = vmul.f32 %v1250_v12, %v2247_v62  ;;  %v1276_v19 = vmul.f32 %v1254_v2, %v2297_v38  ;;  %v2874_v38 = vld [vmem:[#allocation2 + $0x50] sm:$0xff] }
 0x2ee   : > { %v1274_v3 = vmul.f32 %v2862_v47, %v1254_v2  ;;  %v1275_v62 = vmul.f32 %v2865_v46, %v1254_v2  ;;  %v1278_v8 = vmul.f32 %v2874_v38, %v1258_v41 }
 0x2ef   : > { %1310 = vrot.lane.b32.xlu0 %v1271_v53, %s2009_s20  ;;  %1314 = vrot.lane.b32.xlu2 %v1273_v48, %s2009_s20 }
 0x2f0   : > { %1312 = vrot.lane.b32.xlu1 %v1272_v16, %s2009_s20 }
 0x2f4   : > { %v1262_v55 = vpop.permute.xlu1 %1261 }
 0x2f5   : > { %v1280_v54 = vmul.f32 %v2881_v23, %v1262_v55  ;;  %v1281_v30 = vmul.f32 %v2884_v36, %v1262_v55  ;;  %v1282_v22 = vmul.f32 %v1262_v55, %v2348_v9 }
 0x2f7   : > { %1316 = vrot.lane.b32.xlu0 %v1274_v3, %s2009_s20  ;;  %1320 = vrot.lane.b32.xlu2 %v1276_v19, %s2009_s20 }
 0x2f8   : > { %1318 = vrot.lane.b32.xlu1 %v1275_v62, %s2009_s20 }
 0x2ff   : > { %1322 = vrot.lane.b32.xlu0 %v1277_v20, %s2009_s20  ;;  %1326 = vrot.lane.b32.xlu2 %v1279_v4, %s2009_s20 }
 0x300   : > { %1324 = vrot.lane.b32.xlu1 %v1278_v8, %s2009_s20 }
 0x307   : > { %1328 = vrot.lane.b32.xlu0 %v1280_v54, %s2009_s20  ;;  %1332 = vrot.lane.b32.xlu2 %v1282_v22, %s2009_s20 }
 0x308   : > { %1330 = vrot.lane.b32.xlu1 %v1281_v30, %s2009_s20 }
 0x30f   : > { %1334 = vrot.lane.b32.xlu0 %v1283_v51, %s2009_s20  ;;  %1338 = vrot.lane.b32.xlu2 %v1285_v24, %s2009_s20 }
 0x310   : > { %1336 = vrot.lane.b32.xlu1 %v1284_v11, %s2009_s20 }
 0x317   : > { %1390 = vperm.xlu0 %1942, %v2716_v10   ;;  %1398 = vperm.xlu2 %1944, %v2704_v60  }
 0x318   : > { %1394 = vperm.xlu1 %1943, %v2710_v63  }
 0x31f   : > { %1410 = vperm.xlu0 %1942, %v2734_v17   ;;  %1406 = vperm.xlu2 %1944, %v2722_v13  }
 0x320   : > { %1402 = vperm.xlu1 %1943, %v2728_v18  }
 0x332   : > { %v1309_v9 = vpop.permute.xlu2 %1308 }
 0x333   : > { %v2908_v21 = vadd.f32 %v1309_v9, %v2770_v35 }
 0x349   : > { %v1315_v39 = vpop.permute.xlu2 %1314 }
 0x34a   : > { %v1307_v5 = vpop.permute.xlu1 %1306  ;;  %v2912_v6 = vadd.f32 %v1315_v39, %v2789_v31 }
 0x34b   : > { %v1342_v28 = vsel %vm1340_vm8, %v1307_v5, %v1309_v9  ;;  %v1305_v32 = vpop.permute.xlu0 %1304 }
 0x34c   : > { %v2915_v12 = vadd.f32 %v1342_v28, %v2777_v44  ;;  %v1341_v53 = vsel %vm1340_vm8, %v1305_v32, %v1307_v5 }
 0x34d   : > { %v2919_v16 = vadd.f32 %v1341_v53, %v2774_v43 }
 0x351   : > { %v1321_v48 = vpop.permute.xlu2 %1320 }
 0x352   : > { %v2922_v35 = vadd.f32 %v1321_v48, %v2798_v7 }
 0x359   : > { %v1327_v50 = vpop.permute.xlu2 %1326 }
 0x35a   : > { %v2925_v2 = vadd.f32 %v1327_v50, %v2809_v40 }
 0x361   : > { %v1311_v19 = vpop.permute.xlu0 %1310  ;;  %v1333_v31 = vpop.permute.xlu2 %1332 }
 0x362   : > { %v1313_v3 = vpop.permute.xlu1 %1312  ;;  %v2928_v62 = vadd.f32 %v1333_v31, %v2830_v58 }
 0x363   : > { %v1344_v44 = vsel %vm1340_vm8, %v1313_v3, %v1315_v39  ;;  %v1343_v41 = vsel %vm1340_vm8, %v1311_v19, %v1313_v3  ;;  %v2975_v19 = vld [vmem:[#allocation2 + $0x10] sm:$0xff] }
 0x364   : > { %v2933_v43 = vadd.f32 %v1344_v44, %v2795_v49  ;;  %v2936_v7 = vadd.f32 %v1343_v41, %v2793_v29  ;;  %v2012_v41 = vmov 8  }
 0x365   : > { %1946 = vset.pattern.permute.xlu2 %v2012_v41  ;;  %1945 = vset.pattern.permute.xlu1 %v2012_v41 }
 0x366   : > { %1947 = vset.pattern.permute.xlu0 %v2012_v41 }
 0x369   : > { %v1317_v20 = vpop.permute.xlu0 %1316  ;;  %v1339_v8 = vpop.permute.xlu2 %1338 }
 0x36a   : > { %v1319_v40 = vpop.permute.xlu1 %1318  ;;  %v2939_v4 = vadd.f32 %v1339_v8, %v2841_v26 }
 0x36b   : > { %v1346_v55 = vsel %vm1340_vm8, %v1319_v40, %v1321_v48  ;;  %v1345_v58 = vsel %vm1340_vm8, %v1317_v20, %v1319_v40 }
 0x36c   : > { %v2944_v54 = vadd.f32 %v1346_v55, %v2806_v37  ;;  %v2947_v30 = vadd.f32 %v1345_v58, %v2803_v52 }
 0x371   : > { %v1323_v49 = vpop.permute.xlu0 %1322  ;;  %v1399_v20 = vpop.permute.xlu2 %1398 }
 0x372   : > { %v1325_v22 = vpop.permute.xlu1 %1324  ;;  %v1420_v55 = vmul.f32 %v2865_v46, %v1399_v20  ;;  %v1419_v58 = vmul.f32 %v2862_v47, %v1399_v20 }
 0x373   : > { %v1348_v29 = vsel %vm1340_vm8, %v1325_v22, %v1327_v50  ;;  %v1347_v26 = vsel %vm1340_vm8, %v1323_v49, %v1325_v22 }
 0x374   : > { %v2951_v59 = vadd.f32 %v1348_v29, %v2824_v27  ;;  %v2955_v51 = vadd.f32 %v1347_v26, %v2821_v33  ;;  %v2998_v29 = vld [vmem:[#allocation2 + $0x58] sm:$0xff] }
 0x379   : > { %v1329_v11 = vpop.permute.xlu0 %1328 }
 0x37a   : > { %v1331_v24 = vpop.permute.xlu1 %1330 }
 0x37b   : > { %v1350_v37 = vsel %vm1340_vm8, %v1331_v24, %v1333_v31  ;;  %v1349_v52 = vsel %vm1340_vm8, %v1329_v11, %v1331_v24  ;;  %v2981_v31 = vld [vmem:[#allocation2 + $0x28] sm:$0xff]  ;;  %v1407_v24 = vpop.permute.xlu2 %1406 }
 0x37c   : > { %v2959_v9 = vadd.f32 %v1350_v37, %v2838_v1  ;;  %v2963_v5 = vadd.f32 %v1349_v52, %v2835_v45  ;;  %v1426_v37 = vmul.f32 %v2884_v36, %v1407_v24  ;;  %v3006_v52 = vld [vmem:[#allocation2 + $0x70] sm:$0xff] }
 0x381   : > { %v1335_v39 = vpop.permute.xlu0 %1334 }
 0x382   : > { %v1337_v27 = vpop.permute.xlu1 %1336 }
 0x383   : > { %v1352_v28 = vsel %vm1340_vm8, %v1337_v27, %v1339_v8  ;;  %v1351_v32 = vsel %vm1340_vm8, %v1335_v39, %v1337_v27  ;;  %v2989_v8 = vld [vmem:[#allocation2 + $0x40] sm:$0xff]  ;;  %v1427_v39 = vmul.f32 %v3006_v52, %v1407_v24  ;;  %v1425_v27 = vmul.f32 %v2881_v23, %v1407_v24 }
 0x384   : > { %v2968_v33 = vadd.f32 %v1352_v28, %v2849_v15  ;;  %v2971_v53 = vadd.f32 %v1351_v32, %v2846_v56  ;;  %v1421_v40 = vmul.f32 %v2989_v8, %v1399_v20 }
 0x389   : > { %v1391_v48 = vpop.permute.xlu0 %1390 }
 0x38a   : > { %v1413_v1 = vmul.f32 %v2813_v57, %v1391_v48  ;;  %v1414_v50 = vmul.f32 %v2816_v61, %v1391_v48  ;;  %v1415_v45 = vmul.f32 %v2975_v19, %v1391_v48  ;;  %v1395_v15 = vpop.permute.xlu1 %1394  ;;  %v3014_v48 = vld [vmem:[#allocation2 + $0x88] sm:$0xff] }
 0x38b   : > { %v1418_v56 = vmul.f32 %v2981_v31, %v1395_v15  ;;  %v1417_v3 = vmul.f32 %v2854_v34, %v1395_v15  ;;  %v1416_v44 = vmul.f32 %v2851_v25, %v1395_v15 }
 0x38c   : > { %1453 = vrot.lane.b32.xlu0 %v1415_v45, %s2011_s21  ;;  %1451 = vrot.lane.b32.xlu2 %v1414_v50, %s2011_s21 }
 0x38d   : > { %1449 = vrot.lane.b32.xlu1 %v1413_v1, %s2011_s21 }
 0x391   : > { %v1411_v28 = vpop.permute.xlu0 %1410 }
 0x392   : > { %v1403_v49 = vpop.permute.xlu1 %1402  ;;  %v1429_v32 = vmul.f32 %v2894_v14, %v1411_v28  ;;  %v1430_v1 = vmul.f32 %v3014_v48, %v1411_v28  ;;  %v1428_v50 = vmul.f32 %v2891_v42, %v1411_v28 }
 0x393   : > { %v1423_v22 = vmul.f32 %v2874_v38, %v1403_v49  ;;  %v1424_v26 = vmul.f32 %v2998_v29, %v1403_v49  ;;  %v1422_v11 = vmul.f32 %v2871_v0, %v1403_v49 }
 0x394   : > { %1459 = vrot.lane.b32.xlu0 %v1418_v56, %s2011_s21  ;;  %1457 = vrot.lane.b32.xlu2 %v1417_v3, %s2011_s21 }
 0x395   : > { %1455 = vrot.lane.b32.xlu1 %v1416_v44, %s2011_s21 }
 0x39c   : > { %1465 = vrot.lane.b32.xlu0 %v1421_v40, %s2011_s21  ;;  %1463 = vrot.lane.b32.xlu2 %v1420_v55, %s2011_s21 }
 0x39d   : > { %1461 = vrot.lane.b32.xlu1 %v1419_v58, %s2011_s21 }
 0x3a4   : > { %1471 = vrot.lane.b32.xlu0 %v1424_v26, %s2011_s21  ;;  %1469 = vrot.lane.b32.xlu2 %v1423_v22, %s2011_s21 }
 0x3a5   : > { %1467 = vrot.lane.b32.xlu1 %v1422_v11, %s2011_s21 }
 0x3ac   : > { %1477 = vrot.lane.b32.xlu0 %v1427_v39, %s2011_s21  ;;  %1475 = vrot.lane.b32.xlu2 %v1426_v37, %s2011_s21 }
 0x3ad   : > { %1473 = vrot.lane.b32.xlu1 %v1425_v27, %s2011_s21 }
 0x3b4   : > { %1483 = vrot.lane.b32.xlu0 %v1430_v1, %s2011_s21  ;;  %1481 = vrot.lane.b32.xlu2 %v1429_v32, %s2011_s21 }
 0x3b5   : > { %1479 = vrot.lane.b32.xlu1 %v1428_v50, %s2011_s21 }
 0x3bc   : > { %1543 = vperm.xlu0 %1947, %v2704_v60   ;;  %1539 = vperm.xlu2 %1946, %v2710_v63  }
 0x3bd   : > { %1535 = vperm.xlu1 %1945, %v2716_v10  }
 0x3c4   : > { %1551 = vperm.xlu2 %1946, %v2722_v13  }
 0x3c5   : > { %1547 = vperm.xlu1 %1945, %v2728_v18  }
 0x3cd   : > { %1555 = vperm.xlu1 %1945, %v2734_v17  }
 0x3e6   : > { %v1452_v45 = vpop.permute.xlu2 %1451 }
 0x3ee   : > { %v1458_v15 = vpop.permute.xlu2 %1457 }
 0x3f6   : > { %v1464_v40 = vpop.permute.xlu2 %1463 }
 0x3fe   : > { %v1454_v56 = vpop.permute.xlu0 %1453 }
 0x3ff   : > { %v1450_v3 = vpop.permute.xlu1 %1449  ;;  %v1487_v44 = vsel %vm1485_vm9, %v1452_v45, %v1454_v56  ;;  %v3029_v41 = vadd.f32 %v1454_v56, %v2908_v21 }
 0x400   : > { %v1486_v60 = vsel %vm1485_vm9, %v1450_v3, %v1452_v45  ;;  %v3033_v63 = vadd.f32 %v1487_v44, %v2915_v12 }
 0x401   : > { %v3036_v10 = vadd.f32 %v1486_v60, %v2919_v16 }
 0x406   : > { %v1460_v13 = vpop.permute.xlu0 %1459 }
 0x407   : > { %v1456_v18 = vpop.permute.xlu1 %1455  ;;  %v1489_v17 = vsel %vm1485_vm9, %v1458_v15, %v1460_v13  ;;  %v3040_v20 = vadd.f32 %v1460_v13, %v2912_v6 }
 0x408   : > { %v1488_v55 = vsel %vm1485_vm9, %v1456_v18, %v1458_v15  ;;  %v3044_v21 = vadd.f32 %v1489_v17, %v2933_v43  ;;  %v1470_v43 = vpop.permute.xlu2 %1469 }
 0x409   : > { %v3047_v58 = vadd.f32 %v1488_v55, %v2936_v7 }
 0x40e   : > { %v1466_v12 = vpop.permute.xlu0 %1465 }
 0x40f   : > { %v1462_v49 = vpop.permute.xlu1 %1461  ;;  %v1491_v16 = vsel %vm1485_vm9, %v1464_v40, %v1466_v12  ;;  %v3051_v22 = vadd.f32 %v1466_v12, %v2922_v35 }
 0x410   : > { %v1490_v26 = vsel %vm1485_vm9, %v1462_v49, %v1464_v40  ;;  %v3055_v6 = vadd.f32 %v1491_v16, %v2944_v54  ;;  %v1476_v54 = vpop.permute.xlu2 %1475 }
 0x411   : > { %v3058_v11 = vadd.f32 %v1490_v26, %v2947_v30 }
 0x416   : > { %v1472_v24 = vpop.permute.xlu0 %1471 }
 0x417   : > { %v1468_v37 = vpop.permute.xlu1 %1467  ;;  %v1493_v7 = vsel %vm1485_vm9, %v1470_v43, %v1472_v24  ;;  %v3066_v35 = vadd.f32 %v1472_v24, %v2925_v2 }
 0x418   : > { %v1492_v39 = vsel %vm1485_vm9, %v1468_v37, %v1470_v43  ;;  %v3063_v27 = vadd.f32 %v1493_v7, %v2951_v59  ;;  %v1482_v2 = vpop.permute.xlu2 %1481 }
 0x419   : > { %v3069_v28 = vadd.f32 %v1492_v39, %v2955_v51 }
 0x41e   : > { %v1478_v32 = vpop.permute.xlu0 %1477 }
 0x41f   : > { %v1474_v30 = vpop.permute.xlu1 %1473  ;;  %v1495_v1 = vsel %vm1485_vm9, %v1476_v54, %v1478_v32  ;;  %v3077_v15 = vadd.f32 %v1478_v32, %v2928_v62 }
 0x420   : > { %v1494_v50 = vsel %vm1485_vm9, %v1474_v30, %v1476_v54  ;;  %v3074_v45 = vadd.f32 %v1495_v1, %v2959_v9 }
 0x421   : > { %v3080_v59 = vadd.f32 %v1494_v50, %v2963_v5 }
 0x426   : > { %v1484_v56 = vpop.permute.xlu0 %1483 }
 0x427   : > { %v1480_v51 = vpop.permute.xlu1 %1479  ;;  %v1497_v3 = vsel %vm1485_vm9, %v1482_v2, %v1484_v56  ;;  %v3084_v44 = vadd.f32 %v1484_v56, %v2939_v4  ;;  %v1540_v4 = vpop.permute.xlu2 %1539 }
 0x428   : > { %v1496_v60 = vsel %vm1485_vm9, %v1480_v51, %v1482_v2  ;;  %v3088_v13 = vadd.f32 %v1497_v3, %v2968_v33  ;;  %v1563_v33 = vmul.f32 %v2981_v31, %v1540_v4  ;;  %v1561_v40 = vmul.f32 %v2851_v25, %v1540_v4 }
 0x429   : > { %v3091_v9 = vadd.f32 %v1496_v60, %v2971_v53  ;;  %v1562_v53 = vmul.f32 %v2854_v34, %v1540_v4 }
 0x42f   : > { %v1536_v62 = vpop.permute.xlu1 %1535 }
 0x430   : > { %v1558_v5 = vmul.f32 %v2813_v57, %v1536_v62  ;;  %v1559_v18 = vmul.f32 %v2816_v61, %v1536_v62  ;;  %v1560_v17 = vmul.f32 %v2975_v19, %v1536_v62  ;;  %v1544_v57 = vpop.permute.xlu0 %1543 }
 0x431   : > { %v1566_v61 = vmul.f32 %v2989_v8, %v1544_v57  ;;  %v1565_v19 = vmul.f32 %v2865_v46, %v1544_v57  ;;  %v1564_v55 = vmul.f32 %v2862_v47, %v1544_v57  ;;  %v1552_v47 = vpop.permute.xlu2 %1551 }
 0x432   : > { %1598 = vrot.lane.b32.xlu1 %v1560_v17, %s2013_s22  ;;  %1596 = vrot.lane.b32.xlu0 %v1559_v18, %s2013_s22  ;;  %v1571_v46 = vmul.f32 %v2884_v36, %v1552_v47  ;;  %v1572_v8 = vmul.f32 %v3006_v52, %v1552_v47  ;;  %v1570_v49 = vmul.f32 %v2881_v23, %v1552_v47  ;;  %v1679_v23 = vld [vmem:[%s3253_s3] sm:$0x7]  ;;  %v3308_v52 = vmov 0  }
 0x433   : > { %1594 = vrot.lane.b32.xlu2 %v1558_v5, %s2013_s22  ;;  %vm1680_vm10 = vcmp.gt.f32.partialorder %v1679_v23, 0.5 }
 0x434   : > { %v1681_v26 = vsel %vm1680_vm10, 1, %v3308_v52 }
 0x435   : > { %v1682_v43 = vperm.slane %v1681_v26, 0  ;;  %v1684_v24 = vperm.slane %v1681_v26, 2 }
 0x437   : > { %v1548_v25 = vpop.permute.xlu1 %1547  ;;  %vm3134_vm12 = vcmp.eq.s32.totalorder %v1682_v43, 1  ;;  %vm3142_vm14 = vcmp.eq.s32.totalorder %v1684_v24, 1 }
 0x438   : > { %v1568_v34 = vmul.f32 %v2874_v38, %v1548_v25  ;;  %v1569_v31 = vmul.f32 %v2998_v29, %v1548_v25  ;;  %v1567_v12 = vmul.f32 %v2871_v0, %v1548_v25 }
 0x43a   : > { %1604 = vrot.lane.b32.xlu1 %v1563_v33, %s2013_s22  ;;  %1602 = vrot.lane.b32.xlu0 %v1562_v53, %s2013_s22 }
 0x43b   : > { %1600 = vrot.lane.b32.xlu2 %v1561_v40, %s2013_s22 }
 0x43f   : > { %v1556_v0 = vpop.permute.xlu1 %1555 }
 0x440   : > { %v1574_v38 = vmul.f32 %v2894_v14, %v1556_v0  ;;  %v1575_v29 = vmul.f32 %v3014_v48, %v1556_v0  ;;  %v1573_v16 = vmul.f32 %v2891_v42, %v1556_v0  ;;  %v1683_v14 = vperm.slane %v1681_v26, 1 }
 0x442   : > { %1610 = vrot.lane.b32.xlu1 %v1566_v61, %s2013_s22  ;;  %1608 = vrot.lane.b32.xlu0 %v1565_v19, %s2013_s22  ;;  %vm3138_vm13 = vcmp.eq.s32.totalorder %v1683_v14, 1 }
 0x443   : > { %1606 = vrot.lane.b32.xlu2 %v1564_v55, %s2013_s22 }
 0x44a   : > { %1616 = vrot.lane.b32.xlu1 %v1569_v31, %s2013_s22  ;;  %1614 = vrot.lane.b32.xlu0 %v1568_v34, %s2013_s22 }
 0x44b   : > { %1612 = vrot.lane.b32.xlu2 %v1567_v12, %s2013_s22 }
 0x452   : > { %1622 = vrot.lane.b32.xlu1 %v1572_v8, %s2013_s22  ;;  %1620 = vrot.lane.b32.xlu0 %v1571_v46, %s2013_s22 }
 0x453   : > { %1618 = vrot.lane.b32.xlu2 %v1570_v49, %s2013_s22 }
 0x45a   : > { %1628 = vrot.lane.b32.xlu1 %v1575_v29, %s2013_s22  ;;  %1626 = vrot.lane.b32.xlu0 %v1574_v38, %s2013_s22 }
 0x45b   : > { %1624 = vrot.lane.b32.xlu2 %v1573_v16, %s2013_s22 }
 0x48d   : > { %v1595_v36 = vpop.permute.xlu2 %1594 }
 0x495   : > { %v1601_v42 = vpop.permute.xlu2 %1600 }
 0x49d   : > { %v1607_v60 = vpop.permute.xlu2 %1606 }
 0x4a4   : > { %v1599_v39 = vpop.permute.xlu1 %1598  ;;  %v1597_v54 = vpop.permute.xlu0 %1596 }
 0x4a5   : > { %v1663_v32 = vadd.f32 %v1599_v39, %v3029_v41  ;;  %v1631_v30 = vsel %vm1630_vm11, %v1595_v36, %v1597_v54  ;;  %v1632_v1 = vsel %vm1630_vm11, %v1597_v54, %v1599_v39  ;;  %v1613_v55 = vpop.permute.xlu2 %1612 }
 0x4a6   : > { %v1661_v50 = vadd.f32 %v1631_v30, %v3036_v10  ;;  %v1662_v2 = vadd.f32 %v1632_v1, %v3033_v63 }
 0x4a7   : > { %v1690_v56 = vsel %vm3142_vm14, %v1663_v32, 0.0 }
 0x4a8   : > { %1709 = vst.msk [vmem:[%s3149_s15 + $0x10] sm:$0xff] %vm1708_vm15, %v1690_v56  ;;  %v1688_v51 = vsel %vm3134_vm12, %v1661_v50, 0.0  ;;  %v1689_v41 = vsel %vm3138_vm13, %v1662_v2, 0.0 }
 0x4a9   : > { %1706 = vst [vmem:[%s3149_s15] sm:$0xff] %v1688_v51 }
 0x4aa   : > { %1707 = vst [vmem:[%s3149_s15 + $0x8] sm:$0xff] %v1689_v41 }
 0x4ac   : > { %v1605_v3 = vpop.permute.xlu1 %1604  ;;  %v1603_v10 = vpop.permute.xlu0 %1602 }
 0x4ad   : > { %v1666_v63 = vadd.f32 %v1605_v3, %v3040_v20  ;;  %v1633_v62 = vsel %vm1630_vm11, %v1601_v42, %v1603_v10  ;;  %v1634_v5 = vsel %vm1630_vm11, %v1603_v10, %v1605_v3  ;;  %v1619_v38 = vpop.permute.xlu2 %1618 }
 0x4ae   : > { %v1664_v18 = vadd.f32 %v1633_v62, %v3047_v58  ;;  %v1665_v17 = vadd.f32 %v1634_v5, %v3044_v21 }
 0x4af   : > { %v1693_v4 = vsel %vm3142_vm14, %v1666_v63, 0.0 }
 0x4b0   : > { %1712 = vst.msk [vmem:[%s3149_s15 + $0x28] sm:$0xff] %vm1708_vm15, %v1693_v4  ;;  %v1691_v33 = vsel %vm3134_vm12, %v1664_v18, 0.0  ;;  %v1692_v20 = vsel %vm3138_vm13, %v1665_v17, 0.0 }
 0x4b1   : > { %1710 = vst [vmem:[%s3149_s15 + $0x18] sm:$0xff] %v1691_v33 }
 0x4b2   : > { %1711 = vst [vmem:[%s3149_s15 + $0x20] sm:$0xff] %v1692_v20 }
 0x4b4   : > { %v1611_v53 = vpop.permute.xlu1 %1610  ;;  %v1609_v58 = vpop.permute.xlu0 %1608 }
 0x4b5   : > { %v1669_v21 = vadd.f32 %v1611_v53, %v3051_v22  ;;  %v1635_v40 = vsel %vm1630_vm11, %v1607_v60, %v1609_v58  ;;  %v1636_v57 = vsel %vm1630_vm11, %v1609_v58, %v1611_v53  ;;  %v1625_v14 = vpop.permute.xlu2 %1624 }
 0x4b6   : > { %v1667_v61 = vadd.f32 %v1635_v40, %v3058_v11  ;;  %v1668_v19 = vadd.f32 %v1636_v57, %v3055_v6 }
 0x4b7   : > { %v1696_v25 = vsel %vm3142_vm14, %v1669_v21, 0.0 }
 0x4b8   : > { %1715 = vst.msk [vmem:[%s3149_s15 + $0x40] sm:$0xff] %vm1708_vm15, %v1696_v25  ;;  %v1694_v34 = vsel %vm3134_vm12, %v1667_v61, 0.0  ;;  %v1695_v22 = vsel %vm3138_vm13, %v1668_v19, 0.0 }
 0x4b9   : > { %1713 = vst [vmem:[%s3149_s15 + $0x30] sm:$0xff] %v1694_v34 }
 0x4ba   : > { %1714 = vst [vmem:[%s3149_s15 + $0x38] sm:$0xff] %v1695_v22 }
 0x4bc   : > { %v1617_v11 = vpop.permute.xlu1 %1616  ;;  %v1615_v31 = vpop.permute.xlu0 %1614 }
 0x4bd   : > { %v1672_v6 = vadd.f32 %v1617_v11, %v3066_v35  ;;  %v1637_v12 = vsel %vm1630_vm11, %v1613_v55, %v1615_v31  ;;  %v1638_v47 = vsel %vm1630_vm11, %v1615_v31, %v1617_v11 }
 0x4be   : > { %v1670_v46 = vadd.f32 %v1637_v12, %v3069_v28  ;;  %v1671_v8 = vadd.f32 %v1638_v47, %v3063_v27 }
 0x4bf   : > { %v1699_v49 = vsel %vm3142_vm14, %v1672_v6, 0.0 }
 0x4c0   : > { %1718 = vst.msk [vmem:[%s3149_s15 + $0x58] sm:$0xff] %vm1708_vm15, %v1699_v49  ;;  %v1697_v0 = vsel %vm3134_vm12, %v1670_v46, 0.0  ;;  %v1698_v35 = vsel %vm3138_vm13, %v1671_v8, 0.0 }
 0x4c1   : > { %1716 = vst [vmem:[%s3149_s15 + $0x48] sm:$0xff] %v1697_v0 }
 0x4c2   : > { %1717 = vst [vmem:[%s3149_s15 + $0x50] sm:$0xff] %v1698_v35 }
 0x4c4   : > { %v1623_v28 = vpop.permute.xlu1 %1622  ;;  %v1621_v29 = vpop.permute.xlu0 %1620 }
 0x4c5   : > { %v1675_v27 = vadd.f32 %v1623_v28, %v3077_v15  ;;  %v1639_v16 = vsel %vm1630_vm11, %v1619_v38, %v1621_v29  ;;  %v1640_v23 = vsel %vm1630_vm11, %v1621_v29, %v1623_v28 }
 0x4c6   : > { %v1673_v36 = vadd.f32 %v1639_v16, %v3080_v59  ;;  %v1674_v52 = vadd.f32 %v1640_v23, %v3074_v45 }
 0x4c7   : > { %v1702_v26 = vsel %vm3142_vm14, %v1675_v27, 0.0 }
 0x4c8   : > { %1721 = vst.msk [vmem:[%s3149_s15 + $0x70] sm:$0xff] %vm1708_vm15, %v1702_v26  ;;  %v1700_v43 = vsel %vm3134_vm12, %v1673_v36, 0.0  ;;  %v1701_v15 = vsel %vm3138_vm13, %v1674_v52, 0.0 }
 0x4c9   : > { %1719 = vst [vmem:[%s3149_s15 + $0x60] sm:$0xff] %v1700_v43 }
 0x4ca   : > { %1720 = vst [vmem:[%s3149_s15 + $0x68] sm:$0xff] %v1701_v15 }
 0x4cc   : > { %v1629_v59 = vpop.permute.xlu1 %1628  ;;  %v1627_v24 = vpop.permute.xlu0 %1626 }
 0x4cd   : > { %v1678_v45 = vadd.f32 %v1629_v59, %v3084_v44  ;;  %v1641_v42 = vsel %vm1630_vm11, %v1625_v14, %v1627_v24  ;;  %v1642_v39 = vsel %vm1630_vm11, %v1627_v24, %v1629_v59 }
 0x4ce   : > { %v1676_v54 = vadd.f32 %v1641_v42, %v3091_v9  ;;  %v1677_v32 = vadd.f32 %v1642_v39, %v3088_v13 }
 0x4cf   : > { %v1705_v30 = vsel %vm3142_vm14, %v1678_v45, 0.0 }
 0x4d0   : > { %1724 = vst.msk [vmem:[%s3149_s15 + $0x88] sm:$0xff] %vm1708_vm15, %v1705_v30  ;;  %v1703_v1 = vsel %vm3134_vm12, %v1676_v54, 0.0  ;;  %v1704_v50 = vsel %vm3138_vm13, %v1677_v32, 0.0 }
 0x4d1   : > { %1722 = vst [vmem:[%s3149_s15 + $0x78] sm:$0xff] %v1703_v1 }
 0x4d2   : > { %1723 = vst [vmem:[%s3149_s15 + $0x80] sm:$0xff] %v1704_v50 }
 0x4d3 PF: > { %s14_s17 = sadd.s32 1, %s1994_s17   ;;  %s3315_s15 = smov %s1990_s16 }
 0x4d4   : > { %p11_p5 = scmp.ge.s32.totalorder %s14_s17, 4   ;;  %s3316_s16 = smov %s3318_s18 }
 0x4d6   :  { %13 = sbr.rel (!%p11_p5) target bundleno = 2 (0x2), region = 72 }

</bundles_post_ra>
